<compile_context>
chip_gen: v5e
topology: v5e:2x2
jax: 0.10.0
libtpu: 0.0.40
codegen_flags: <defaults>
</compile_context>

<pallas_src>
import math
import jax
import jax.numpy as jnp
from jax import lax
from jax.experimental import pallas as pl
from jax.experimental.pallas import tpu as pltpu


def make_attention_kernel(T, C, n_head, tq):
    hs = C // n_head
    scale = 1.0 / math.sqrt(hs)

    def kernel(x_ref,
               wq_ref, wk_ref, wv_ref, bq_ref, bk_ref, bv_ref,
               wp_ref, bp_ref,
               o_ref,
               k_sc, v_sc, y_sc):
        qt = pl.program_id(1)
        row0 = qt * tq                                     # first row of this query tile

        x = x_ref[0]                                        # (tq, C) bf16

        # ---- fused full-width projections: bf16 operands, f32 accumulation ----
        def proj(w_ref, b_ref):
            r = jnp.dot(x, w_ref[...], preferred_element_type=jnp.float32)
            return jnp.maximum(r + b_ref[...], 0.0)         # bias + ReLU in f32 (VPU)

        q = proj(wq_ref, bq_ref) * scale                    # (tq, C); 1/sqrt(hs) folded in
        k = proj(wk_ref, bk_ref)
        v = proj(wv_ref, bv_ref)

        # ---- head split: aligned lane slices (hs is a multiple of 128 here) ----
        # TODO(synk): for hs < 128 (e.g. GPT-2 hs=64) pack two heads per 128-lane group
        # to avoid lane padding of the head-major tiles and the K/V scratch.
        q_hm = jnp.stack([q[:, h * hs:(h + 1) * hs] for h in range(n_head)], axis=0)
        q_hm = q_hm.astype(jnp.bfloat16)                    # (H, tq, hs)

        # Append this tile's K/V rows to the running per-batch scratch.  Query tile qt only
        # reads rows [0, row0+tq), all written at steps (b, 0..qt) of the SAME batch element:
        # the grid is iterated b-outer / qt-inner and the qt axis is "arbitrary", so it stays
        # sequential on one core.  Do NOT reorder the grid or shard the qt axis.
        for h in range(n_head):
            k_sc[h, pl.ds(row0, tq), :] = k[:, h * hs:(h + 1) * hs].astype(k_sc.dtype)
            v_sc[h, pl.ds(row0, tq), :] = v[:, h * hs:(h + 1) * hs].astype(v_sc.dtype)

        # ---- key-tiled causal attention: only key tiles kt <= qt are ever touched ----
        y_sc[...] = jnp.zeros_like(y_sc)
        rows = row0 + lax.broadcasted_iota(jnp.int32, (tq, tq), 0)

        @pl.loop(0, qt + 1)
        def _(kt):
            koff = pl.multiple_of(kt * tq, tq)
            kt_k = k_sc[:, pl.ds(koff, tq), :]              # (H, tq, hs) bf16
            kt_v = v_sc[:, pl.ds(koff, tq), :]
            att = jnp.einsum("hqd,hkd->hqk", q_hm, kt_k,
                             preferred_element_type=jnp.float32)   # (H, tq, tq) f32
            # Causal mask fused with ReLU (masked -> 0, matching relu(-inf) == 0).  Only the
            # diagonal tile (kt == qt) has masked entries; earlier tiles pass straight through.
            cols = koff + lax.broadcasted_iota(jnp.int32, (tq, tq), 1)
            p = jnp.where((cols <= rows)[None], jnp.maximum(att, 0.0), 0.0)
            y_sc[...] += jnp.einsum("hqk,hkd->hqd", p.astype(jnp.bfloat16), kt_v,
                                    preferred_element_type=jnp.float32)
        # TODO(synk): attn_dropout / resid_dropout are identity (eval mode).

        # ---- output projection: merge heads along lanes, one (tq,C)x(C,C) contraction ----
        y2d = jnp.concatenate([y_sc[h] for h in range(n_head)], axis=-1)    # (tq, C) f32
        out = jnp.dot(y2d.astype(jnp.bfloat16), wp_ref[...],
                      preferred_element_type=jnp.float32) + bp_ref[...]
        o_ref[0] = out.astype(o_ref.dtype)

    return kernel


def causal_self_attention(x, w_attn, b_attn, w_proj, b_proj, n_head, tq=None):
    """x: (B, T, C) f32.  w_attn: (C, 3C) [in, out], b_attn: (1, 3C),
    w_proj: (C, C) [in, out], b_proj: (1, C)."""
    B, T, C = x.shape
    assert C % n_head == 0
    hs = C // n_head

    if tq is None:
        # Re-derive per generation: 256 fits comfortably within v7x's 64 MiB VMEM; v5e/v6e
        # (128 MiB) can take larger tiles.  Multiples of 16 keep the bf16 sublane tiling happy.
        tq = min(T, 256)
    assert T % tq == 0 and (tq % 16 == 0 or tq == T)
    n_qt = T // tq

    # bf16 MXU operands prepared once on the wrapper side (halves x / weight HBM traffic).
    xb = x.astype(jnp.bfloat16)
    w_q, w_k, w_v = (w_attn[:, i * C:(i + 1) * C].astype(jnp.bfloat16) for i in range(3))
    b_q, b_k, b_v = (b_attn[:, i * C:(i + 1) * C] for i in range(3))     # biases stay f32
    w_p = w_proj.astype(jnp.bfloat16)

    kernel = make_attention_kernel(T, C, n_head, tq)

    # qkv (6*T*C*C) + out proj (2*T*C*C) + causally-skipped attention (~2*T*(T+tq)*C), per batch.
    flops = int(B * (8 * T * C * C + 2 * T * (T + tq) * C))
    bytes_accessed = int(B * T * C * (2 + 4) + 4 * C * C * 2 + 4 * C * 4)

    # Explicit VMEM budget: blocked x/out (double-buffered), resident weights, scratch,
    # plus headroom for in-kernel intermediates.
    buf_bytes = (2 * tq * C * 2 + 2 * tq * C * 4           # x / out blocks (2 buffers each)
                 + 4 * C * C * 2 + 4 * C * 4               # resident weights + biases
                 + 2 * n_head * T * hs * 2                 # K/V scratch (bf16)
                 + n_head * tq * hs * 4)                   # per-tile output accumulator (f32)
    vmem_limit = int(min(max(4 * buf_bytes, 32 << 20), 100 << 20))

    vmem_resident = pl.BlockSpec(memory_space=pltpu.MemorySpace.VMEM)

    return pl.pallas_call(
        kernel,
        out_shape=jax.ShapeDtypeStruct((B, T, C), x.dtype),
        grid_spec=pltpu.PrefetchScalarGridSpec(
            num_scalar_prefetch=0,
            grid=(B, n_qt),
            in_specs=[
                pl.BlockSpec((1, tq, C), lambda b, qt: (b, qt, 0)),    # x: query tile
                vmem_resident, vmem_resident, vmem_resident,           # w_q, w_k, w_v
                vmem_resident, vmem_resident, vmem_resident,           # b_q, b_k, b_v
                vmem_resident, vmem_resident,                          # w_proj, b_proj
            ],
            out_specs=pl.BlockSpec((1, tq, C), lambda b, qt: (b, qt, 0)),
            scratch_shapes=[
                pltpu.VMEM((n_head, T, hs), jnp.bfloat16),   # K rows seen so far (this batch)
                pltpu.VMEM((n_head, T, hs), jnp.bfloat16),   # V rows seen so far (this batch)
                pltpu.VMEM((n_head, tq, hs), jnp.float32),   # y accumulator for this tile
            ],
        ),
        compiler_params=pltpu.CompilerParams(
            dimension_semantics=("parallel", "arbitrary"),
            vmem_limit_bytes=vmem_limit),
        cost_estimate=pl.CostEstimate(
            flops=flops, transcendentals=0, bytes_accessed=bytes_accessed),
    )(xb, w_q, w_k, w_v, b_q, b_k, b_v, w_p, b_proj)


def reference(x, w_attn, b_attn, w_proj, b_proj, n_head):
    B, T, C = x.shape
    hs = C // n_head
    qkv = x @ w_attn + b_attn                                      # (B, T, 3C)
    q, k, v = jnp.split(qkv, 3, axis=-1)
    q, k, v = (jax.nn.relu(t) for t in (q, k, v))
    def heads(t):
        return t.reshape(B, T, n_head, hs).transpose(0, 2, 1, 3)   # (B, H, T, hs)
    q, k, v = heads(q), heads(k), heads(v)
    att = jnp.einsum("bhqd,bhkd->bhqk", q, k) / math.sqrt(hs)
    mask = jnp.tril(jnp.ones((T, T), bool))
    att = jnp.where(mask[None, None], att, -jnp.inf)
    att = jax.nn.relu(att)
    y = jnp.einsum("bhqk,bhkd->bhqd", att, v)
    y = y.transpose(0, 2, 1, 3).reshape(B, T, C)
    return y @ w_proj + b_proj


if __name__ == "__main__":
    # config: n_embd=256, n_head=2 (hs=128 -> lane-aligned head slices), seq T=64, batch B=2.
    # tq=16 -> 4 query tiles: exercises the incremental K/V scratch fill and causal key tiling.
    B, T, C, n_head = 2, 64, 256, 2

    key = jax.random.PRNGKey(0)
    kx, k1, k2, k3, k4 = jax.random.split(key, 5)

    x = jax.random.normal(kx, (B, T, C), dtype=jnp.float32)

    # Deterministic parameter init (torch Linear-like scale). Stored as [in, out].
    lim = 1.0 / math.sqrt(C)
    w_attn = jax.random.uniform(k1, (C, 3 * C), jnp.float32, -lim, lim)
    b_attn = jax.random.uniform(k2, (1, 3 * C), jnp.float32, -lim, lim)
    w_proj = jax.random.uniform(k3, (C, C), jnp.float32, -lim, lim)
    b_proj = jax.random.uniform(k4, (1, C), jnp.float32, -lim, lim)

    out = causal_self_attention(x, w_attn, b_attn, w_proj, b_proj, n_head, tq=16)
    out = jax.block_until_ready(out)

    ref = reference(x, w_attn, b_attn, w_proj, b_proj, n_head)
    # bf16 MXU operands vs f32 reference -> loosened tolerance (still catches mask/index bugs).
    assert jnp.allclose(out, ref, rtol=2e-2, atol=1e-1), "mismatch vs pure-JAX reference"

    print("KERNEL_OK")
</pallas_src>

<mosaic_0001>
module attributes {stable_mosaic.version = 11 : i64} {
  func.func @kernel(%arg0: i32, %arg1: i32, %arg2: memref<1x16x256xbf16, #tpu.memory_space<vmem>>, %arg3: memref<256x256xbf16, #tpu.memory_space<vmem>>, %arg4: memref<256x256xbf16, #tpu.memory_space<vmem>>, %arg5: memref<256x256xbf16, #tpu.memory_space<vmem>>, %arg6: memref<1x256xf32, #tpu.memory_space<vmem>>, %arg7: memref<1x256xf32, #tpu.memory_space<vmem>>, %arg8: memref<1x256xf32, #tpu.memory_space<vmem>>, %arg9: memref<256x256xbf16, #tpu.memory_space<vmem>>, %arg10: memref<1x256xf32, #tpu.memory_space<vmem>>, %arg11: memref<1x16x256xf32, #tpu.memory_space<vmem>>, %arg12: memref<2x64x128xbf16, #tpu.memory_space<vmem>>, %arg13: memref<2x64x128xbf16, #tpu.memory_space<vmem>>, %arg14: memref<2x16x128xf32, #tpu.memory_space<vmem>>) attributes {dimension_semantics = [#tpu.dimension_semantics<parallel>, #tpu.dimension_semantics<arbitrary>], iteration_bounds = array<i64: 2, 4>, scalar_prefetch = 0 : i64, scratch_operands = 3 : i64, tpu.core_type = #tpu.core_type<tc>, window_params = [{transform_indices = @transform_0, window_bounds = array<i64: 1, 16, 256>}, {pipeline_mode = #tpu.pipeline_mode<synchronous>, transform_indices = @transform_1, window_bounds = array<i64: 256, 256>}, {pipeline_mode = #tpu.pipeline_mode<synchronous>, transform_indices = @transform_2, window_bounds = array<i64: 256, 256>}, {pipeline_mode = #tpu.pipeline_mode<synchronous>, transform_indices = @transform_3, window_bounds = array<i64: 256, 256>}, {pipeline_mode = #tpu.pipeline_mode<synchronous>, transform_indices = @transform_4, window_bounds = array<i64: 1, 256>}, {pipeline_mode = #tpu.pipeline_mode<synchronous>, transform_indices = @transform_5, window_bounds = array<i64: 1, 256>}, {pipeline_mode = #tpu.pipeline_mode<synchronous>, transform_indices = @transform_6, window_bounds = array<i64: 1, 256>}, {pipeline_mode = #tpu.pipeline_mode<synchronous>, transform_indices = @transform_7, window_bounds = array<i64: 256, 256>}, {pipeline_mode = #tpu.pipeline_mode<synchronous>, transform_indices = @transform_8, window_bounds = array<i64: 1, 256>}, {transform_indices = @transform_9, window_bounds = array<i64: 1, 16, 256>}]} {
    %c16_i32 = arith.constant 16 : i32
    %0 = arith.muli %arg1, %c16_i32 : i32
    %c0 = arith.constant 0 : index
    %c0_0 = arith.constant 0 : index
    %c0_1 = arith.constant 0 : index
    %1 = vector.load %arg2[%c0, %c0_0, %c0_1] : memref<1x16x256xbf16, #tpu.memory_space<vmem>>, vector<1x16x256xbf16>
    %2 = vector.shape_cast %1 : vector<1x16x256xbf16> to vector<16x256xbf16>
    %c0_2 = arith.constant 0 : index
    %c0_3 = arith.constant 0 : index
    %3 = vector.load %arg3[%c0_2, %c0_3] : memref<256x256xbf16, #tpu.memory_space<vmem>>, vector<256x256xbf16>
    %cst = arith.constant dense<0.000000e+00> : vector<16x256xf32>
    %4 = tpu.matmul %2, %3, %cst {dimension_numbers = #tpu.dot_dimension_numbers<[1], [0], [0], [1], [0, 0, 1, 1], [], []>} : vector<16x256xbf16>, vector<256x256xbf16>, vector<16x256xf32> -> vector<16x256xf32>
    %c0_4 = arith.constant 0 : index
    %c0_5 = arith.constant 0 : index
    %5 = vector.load %arg6[%c0_4, %c0_5] : memref<1x256xf32, #tpu.memory_space<vmem>>, vector<1x256xf32>
    %6 = vector.broadcast %5 : vector<1x256xf32> to vector<16x256xf32>
    %7 = arith.addf %4, %6 : vector<16x256xf32>
    %cst_6 = arith.constant 0.000000e+00 : f32
    %8 = vector.broadcast %cst_6 : f32 to vector<16x256xf32>
    %9 = arith.maximumf %7, %8 : vector<16x256xf32>
    %cst_7 = arith.constant 0.0883883461 : f32
    %10 = vector.broadcast %cst_7 : f32 to vector<16x256xf32>
    %11 = arith.mulf %9, %10 : vector<16x256xf32>
    %c0_8 = arith.constant 0 : index
    %c0_9 = arith.constant 0 : index
    %12 = vector.load %arg4[%c0_8, %c0_9] : memref<256x256xbf16, #tpu.memory_space<vmem>>, vector<256x256xbf16>
    %cst_10 = arith.constant dense<0.000000e+00> : vector<16x256xf32>
    %13 = tpu.matmul %2, %12, %cst_10 {dimension_numbers = #tpu.dot_dimension_numbers<[1], [0], [0], [1], [0, 0, 1, 1], [], []>} : vector<16x256xbf16>, vector<256x256xbf16>, vector<16x256xf32> -> vector<16x256xf32>
    %c0_11 = arith.constant 0 : index
    %c0_12 = arith.constant 0 : index
    %14 = vector.load %arg7[%c0_11, %c0_12] : memref<1x256xf32, #tpu.memory_space<vmem>>, vector<1x256xf32>
    %15 = vector.broadcast %14 : vector<1x256xf32> to vector<16x256xf32>
    %16 = arith.addf %13, %15 : vector<16x256xf32>
    %cst_13 = arith.constant 0.000000e+00 : f32
    %17 = vector.broadcast %cst_13 : f32 to vector<16x256xf32>
    %18 = arith.maximumf %16, %17 : vector<16x256xf32>
    %c0_14 = arith.constant 0 : index
    %c0_15 = arith.constant 0 : index
    %19 = vector.load %arg5[%c0_14, %c0_15] : memref<256x256xbf16, #tpu.memory_space<vmem>>, vector<256x256xbf16>
    %cst_16 = arith.constant dense<0.000000e+00> : vector<16x256xf32>
    %20 = tpu.matmul %2, %19, %cst_16 {dimension_numbers = #tpu.dot_dimension_numbers<[1], [0], [0], [1], [0, 0, 1, 1], [], []>} : vector<16x256xbf16>, vector<256x256xbf16>, vector<16x256xf32> -> vector<16x256xf32>
    %c0_17 = arith.constant 0 : index
    %c0_18 = arith.constant 0 : index
    %21 = vector.load %arg8[%c0_17, %c0_18] : memref<1x256xf32, #tpu.memory_space<vmem>>, vector<1x256xf32>
    %22 = vector.broadcast %21 : vector<1x256xf32> to vector<16x256xf32>
    %23 = arith.addf %20, %22 : vector<16x256xf32>
    %cst_19 = arith.constant 0.000000e+00 : f32
    %24 = vector.broadcast %cst_19 : f32 to vector<16x256xf32>
    %25 = arith.maximumf %23, %24 : vector<16x256xf32>
    %26 = vector.extract_strided_slice %11 {offsets = [0, 0], sizes = [16, 128], strides = [1, 1]} : vector<16x256xf32> to vector<16x128xf32>
    %27 = vector.extract_strided_slice %11 {offsets = [0, 128], sizes = [16, 128], strides = [1, 1]} : vector<16x256xf32> to vector<16x128xf32>
    %28 = vector.shape_cast %26 : vector<16x128xf32> to vector<1x16x128xf32>
    %29 = vector.shape_cast %27 : vector<16x128xf32> to vector<1x16x128xf32>
    %30 = tpu.concatenate %28, %29 in 0 : vector<1x16x128xf32>, vector<1x16x128xf32> -> vector<2x16x128xf32>
    %31 = arith.truncf %30 : vector<2x16x128xf32> to vector<2x16x128xbf16>
    %32 = vector.extract_strided_slice %18 {offsets = [0, 0], sizes = [16, 128], strides = [1, 1]} : vector<16x256xf32> to vector<16x128xf32>
    %33 = arith.truncf %32 : vector<16x128xf32> to vector<16x128xbf16>
    %c0_20 = arith.constant 0 : index
    %34 = arith.index_cast %0 : i32 to index
    %c0_21 = arith.constant 0 : index
    %35 = vector.load %arg12[%c0_20, %34, %c0_21] : memref<2x64x128xbf16, #tpu.memory_space<vmem>>, vector<1x16x128xbf16>
    %36 = vector.shape_cast %35 : vector<1x16x128xbf16> to vector<16x128xbf16>
    %37 = vector.shape_cast %33 : vector<16x128xbf16> to vector<1x16x128xbf16>
    tpu.vector_store %arg12[%c0_20, %34, %c0_21], %37 {strides = array<i32>} : memref<2x64x128xbf16, #tpu.memory_space<vmem>>, vector<1x16x128xbf16>,
    %38 = vector.extract_strided_slice %25 {offsets = [0, 0], sizes = [16, 128], strides = [1, 1]} : vector<16x256xf32> to vector<16x128xf32>
    %39 = arith.truncf %38 : vector<16x128xf32> to vector<16x128xbf16>
    %c0_22 = arith.constant 0 : index
    %40 = arith.index_cast %0 : i32 to index
    %c0_23 = arith.constant 0 : index
    %41 = vector.load %arg13[%c0_22, %40, %c0_23] : memref<2x64x128xbf16, #tpu.memory_space<vmem>>, vector<1x16x128xbf16>
    %42 = vector.shape_cast %41 : vector<1x16x128xbf16> to vector<16x128xbf16>
    %43 = vector.shape_cast %39 : vector<16x128xbf16> to vector<1x16x128xbf16>
    tpu.vector_store %arg13[%c0_22, %40, %c0_23], %43 {strides = array<i32>} : memref<2x64x128xbf16, #tpu.memory_space<vmem>>, vector<1x16x128xbf16>,
    %44 = vector.extract_strided_slice %18 {offsets = [0, 128], sizes = [16, 128], strides = [1, 1]} : vector<16x256xf32> to vector<16x128xf32>
    %45 = arith.truncf %44 : vector<16x128xf32> to vector<16x128xbf16>
    %c1 = arith.constant 1 : index
    %46 = arith.index_cast %0 : i32 to index
    %c0_24 = arith.constant 0 : index
    %47 = vector.load %arg12[%c1, %46, %c0_24] : memref<2x64x128xbf16, #tpu.memory_space<vmem>>, vector<1x16x128xbf16>
    %48 = vector.shape_cast %47 : vector<1x16x128xbf16> to vector<16x128xbf16>
    %49 = vector.shape_cast %45 : vector<16x128xbf16> to vector<1x16x128xbf16>
    tpu.vector_store %arg12[%c1, %46, %c0_24], %49 {strides = array<i32>} : memref<2x64x128xbf16, #tpu.memory_space<vmem>>, vector<1x16x128xbf16>,
    %50 = vector.extract_strided_slice %25 {offsets = [0, 128], sizes = [16, 128], strides = [1, 1]} : vector<16x256xf32> to vector<16x128xf32>
    %51 = arith.truncf %50 : vector<16x128xf32> to vector<16x128xbf16>
    %c1_25 = arith.constant 1 : index
    %52 = arith.index_cast %0 : i32 to index
    %c0_26 = arith.constant 0 : index
    %53 = vector.load %arg13[%c1_25, %52, %c0_26] : memref<2x64x128xbf16, #tpu.memory_space<vmem>>, vector<1x16x128xbf16>
    %54 = vector.shape_cast %53 : vector<1x16x128xbf16> to vector<16x128xbf16>
    %55 = vector.shape_cast %51 : vector<16x128xbf16> to vector<1x16x128xbf16>
    tpu.vector_store %arg13[%c1_25, %52, %c0_26], %55 {strides = array<i32>} : memref<2x64x128xbf16, #tpu.memory_space<vmem>>, vector<1x16x128xbf16>,
    %cst_27 = arith.constant 0.000000e+00 : f32
    %56 = vector.broadcast %cst_27 : f32 to vector<2x16x128xf32>
    %c0_28 = arith.constant 0 : index
    %c0_29 = arith.constant 0 : index
    %c0_30 = arith.constant 0 : index
    %57 = vector.load %arg14[%c0_28, %c0_29, %c0_30] : memref<2x16x128xf32, #tpu.memory_space<vmem>>, vector<2x16x128xf32>
    tpu.vector_store %arg14[%c0_28, %c0_29, %c0_30], %56 {strides = array<i32>} : memref<2x16x128xf32, #tpu.memory_space<vmem>>, vector<2x16x128xf32>,
    %58 = tpu.iota {dimensions = array<i32: 0>} : vector<16x16xi32>
    %59 = vector.broadcast %0 : i32 to vector<16x16xi32>
    %60 = arith.addi %59, %58 : vector<16x16xi32>
    %c1_i32 = arith.constant 1 : i32
    %61 = arith.addi %arg1, %c1_i32 : i32
    %c0_i32 = arith.constant 0 : i32
    %62 = arith.subi %61, %c0_i32 : i32
    %c1_i32_31 = arith.constant 1 : i32
    %c1_i32_32 = arith.constant 1 : i32
    %63 = arith.subi %c1_i32_31, %c1_i32_32 : i32
    %64 = arith.addi %62, %63 : i32
    %c1_i32_33 = arith.constant 1 : i32
    %65 = arith.divsi %64, %c1_i32_33 : i32
    %c1_i32_34 = arith.constant 1 : i32
    %c0_i32_35 = arith.constant 0 : i32
    %c0_i32_36 = arith.constant 0 : i32
    %66 = arith.subi %65, %c0_i32_36 : i32
    %67 = arith.addi %c0_i32_36, %66 : i32
    %c1_i32_37 = arith.constant 1 : i32
    scf.for %arg15 = %c0_i32_36 to %67 step %c1_i32_37  : i32 {
      %82 = arith.muli %arg15, %c1_i32_34 : i32
      %83 = arith.addi %c0_i32_35, %82 : i32
      %c16_i32_52 = arith.constant 16 : i32
      %84 = arith.muli %83, %c16_i32_52 : i32
      %85 = tpu.assume_multiple %84, 16 : i32
      %c0_53 = arith.constant 0 : index
      %86 = arith.index_cast %85 : i32 to index
      %c0_54 = arith.constant 0 : index
      %87 = vector.load %arg12[%c0_53, %86, %c0_54] : memref<2x64x128xbf16, #tpu.memory_space<vmem>>, vector<2x16x128xbf16>
      %c0_55 = arith.constant 0 : index
      %88 = arith.index_cast %85 : i32 to index
      %c0_56 = arith.constant 0 : index
      %89 = vector.load %arg13[%c0_55, %88, %c0_56] : memref<2x64x128xbf16, #tpu.memory_space<vmem>>, vector<2x16x128xbf16>
      "tpu.trace_start"() <{level = 10 : i32, message = "hqd,hkd->hqk"}> : () -> ()
      %cst_57 = arith.constant dense<0.000000e+00> : vector<2x16x16xf32>
      %90 = tpu.matmul %31, %87, %cst_57 {dimension_numbers = #tpu.dot_dimension_numbers<[2], [2], [1], [1], [0, 0, 0, 1, 1, 1], [0], [0]>} : vector<2x16x128xbf16>, vector<2x16x128xbf16>, vector<2x16x16xf32> -> vector<2x16x16xf32>
      "tpu.trace_stop"() : () -> ()
      %91 = tpu.iota {dimensions = array<i32: 1>} : vector<16x16xi32>
      %92 = vector.broadcast %85 : i32 to vector<16x16xi32>
      %93 = arith.addi %92, %91 : vector<16x16xi32>
      %94 = arith.cmpi sle, %93, %60 : vector<16x16xi32>
      %95 = vector.shape_cast %94 : vector<16x16xi1> to vector<1x16x16xi1>
      %cst_58 = arith.constant 0.000000e+00 : f32
      %96 = vector.broadcast %cst_58 : f32 to vector<2x16x16xf32>
      %97 = arith.maximumf %90, %96 : vector<2x16x16xf32>
      %cst_59 = arith.constant 0.000000e+00 : f32
      %98 = vector.shape_cast %95 : vector<1x16x16xi1> to vector<1x16x16xi1>
      %99 = vector.broadcast %98 : vector<1x16x16xi1> to vector<2x16x16xi1>
      %100 = vector.broadcast %cst_59 : f32 to vector<2x16x16xf32>
      %101 = arith.select %99, %97, %100 : vector<2x16x16xi1>, vector<2x16x16xf32>
      %c0_60 = arith.constant 0 : index
      %c0_61 = arith.constant 0 : index
      %c0_62 = arith.constant 0 : index
      %102 = vector.load %arg14[%c0_60, %c0_61, %c0_62] : memref<2x16x128xf32, #tpu.memory_space<vmem>>, vector<2x16x128xf32>
      %103 = arith.truncf %101 : vector<2x16x16xf32> to vector<2x16x16xbf16>
      "tpu.trace_start"() <{level = 10 : i32, message = "hqk,hkd->hqd"}> : () -> ()
      %cst_63 = arith.constant dense<0.000000e+00> : vector<2x16x128xf32>
      %104 = tpu.matmul %103, %89, %cst_63 {dimension_numbers = #tpu.dot_dimension_numbers<[2], [1], [1], [2], [0, 0, 0, 1, 1, 2], [0], [0]>} : vector<2x16x16xbf16>, vector<2x16x128xbf16>, vector<2x16x128xf32> -> vector<2x16x128xf32>
      "tpu.trace_stop"() : () -> ()
      %105 = arith.addf %102, %104 : vector<2x16x128xf32>
      %c0_64 = arith.constant 0 : index
      %c0_65 = arith.constant 0 : index
      %c0_66 = arith.constant 0 : index
      %106 = vector.load %arg14[%c0_64, %c0_65, %c0_66] : memref<2x16x128xf32, #tpu.memory_space<vmem>>, vector<2x16x128xf32>
      tpu.vector_store %arg14[%c0_64, %c0_65, %c0_66], %105 {strides = array<i32>} : memref<2x16x128xf32, #tpu.memory_space<vmem>>, vector<2x16x128xf32>,
    }
    %c0_38 = arith.constant 0 : index
    %c0_39 = arith.constant 0 : index
    %c0_40 = arith.constant 0 : index
    %68 = vector.load %arg14[%c0_38, %c0_39, %c0_40] : memref<2x16x128xf32, #tpu.memory_space<vmem>>, vector<1x16x128xf32>
    %69 = vector.shape_cast %68 : vector<1x16x128xf32> to vector<16x128xf32>
    %c1_41 = arith.constant 1 : index
    %c0_42 = arith.constant 0 : index
    %c0_43 = arith.constant 0 : index
    %70 = vector.load %arg14[%c1_41, %c0_42, %c0_43] : memref<2x16x128xf32, #tpu.memory_space<vmem>>, vector<1x16x128xf32>
    %71 = vector.shape_cast %70 : vector<1x16x128xf32> to vector<16x128xf32>
    %72 = tpu.concatenate %69, %71 in 1 : vector<16x128xf32>, vector<16x128xf32> -> vector<16x256xf32>
    %73 = arith.truncf %72 : vector<16x256xf32> to vector<16x256xbf16>
    %c0_44 = arith.constant 0 : index
    %c0_45 = arith.constant 0 : index
    %74 = vector.load %arg9[%c0_44, %c0_45] : memref<256x256xbf16, #tpu.memory_space<vmem>>, vector<256x256xbf16>
    %cst_46 = arith.constant dense<0.000000e+00> : vector<16x256xf32>
    %75 = tpu.matmul %73, %74, %cst_46 {dimension_numbers = #tpu.dot_dimension_numbers<[1], [0], [0], [1], [0, 0, 1, 1], [], []>} : vector<16x256xbf16>, vector<256x256xbf16>, vector<16x256xf32> -> vector<16x256xf32>
    %c0_47 = arith.constant 0 : index
    %c0_48 = arith.constant 0 : index
    %76 = vector.load %arg10[%c0_47, %c0_48] : memref<1x256xf32, #tpu.memory_space<vmem>>, vector<1x256xf32>
    %77 = vector.broadcast %76 : vector<1x256xf32> to vector<16x256xf32>
    %78 = arith.addf %75, %77 : vector<16x256xf32>
    %c0_49 = arith.constant 0 : index
    %c0_50 = arith.constant 0 : index
    %c0_51 = arith.constant 0 : index
    %79 = vector.load %arg11[%c0_49, %c0_50, %c0_51] : memref<1x16x256xf32, #tpu.memory_space<vmem>>, vector<1x16x256xf32>
    %80 = vector.shape_cast %79 : vector<1x16x256xf32> to vector<16x256xf32>
    %81 = vector.shape_cast %78 : vector<16x256xf32> to vector<1x16x256xf32>
    tpu.vector_store %arg11[%c0_49, %c0_50, %c0_51], %81 {strides = array<i32>} : memref<1x16x256xf32, #tpu.memory_space<vmem>>, vector<1x16x256xf32>,
    return
  }
  func.func @transform_0(%arg0: i32, %arg1: i32) -> (i32, i32, i32) {
    %c0_i32 = arith.constant 0 : i32
    %c0_i32_0 = arith.constant 0 : i32
    return %arg0, %arg1, %c0_i32 : i32, i32, i32
  }
  func.func @transform_1(%arg0: i32, %arg1: i32) -> (i32, i32) {
    %c0_i32 = arith.constant 0 : i32
    %c0_i32_0 = arith.constant 0 : i32
    %c0_i32_1 = arith.constant 0 : i32
    return %c0_i32, %c0_i32_0 : i32, i32
  }
  func.func @transform_2(%arg0: i32, %arg1: i32) -> (i32, i32) {
    %c0_i32 = arith.constant 0 : i32
    %c0_i32_0 = arith.constant 0 : i32
    %c0_i32_1 = arith.constant 0 : i32
    return %c0_i32, %c0_i32_0 : i32, i32
  }
  func.func @transform_3(%arg0: i32, %arg1: i32) -> (i32, i32) {
    %c0_i32 = arith.constant 0 : i32
    %c0_i32_0 = arith.constant 0 : i32
    %c0_i32_1 = arith.constant 0 : i32
    return %c0_i32, %c0_i32_0 : i32, i32
  }
  func.func @transform_4(%arg0: i32, %arg1: i32) -> (i32, i32) {
    %c0_i32 = arith.constant 0 : i32
    %c0_i32_0 = arith.constant 0 : i32
    %c0_i32_1 = arith.constant 0 : i32
    return %c0_i32, %c0_i32_0 : i32, i32
  }
  func.func @transform_5(%arg0: i32, %arg1: i32) -> (i32, i32) {
    %c0_i32 = arith.constant 0 : i32
    %c0_i32_0 = arith.constant 0 : i32
    %c0_i32_1 = arith.constant 0 : i32
    return %c0_i32, %c0_i32_0 : i32, i32
  }
  func.func @transform_6(%arg0: i32, %arg1: i32) -> (i32, i32) {
    %c0_i32 = arith.constant 0 : i32
    %c0_i32_0 = arith.constant 0 : i32
    %c0_i32_1 = arith.constant 0 : i32
    return %c0_i32, %c0_i32_0 : i32, i32
  }
  func.func @transform_7(%arg0: i32, %arg1: i32) -> (i32, i32) {
    %c0_i32 = arith.constant 0 : i32
    %c0_i32_0 = arith.constant 0 : i32
    %c0_i32_1 = arith.constant 0 : i32
    return %c0_i32, %c0_i32_0 : i32, i32
  }
  func.func @transform_8(%arg0: i32, %arg1: i32) -> (i32, i32) {
    %c0_i32 = arith.constant 0 : i32
    %c0_i32_0 = arith.constant 0 : i32
    %c0_i32_1 = arith.constant 0 : i32
    return %c0_i32, %c0_i32_0 : i32, i32
  }
  func.func @transform_9(%arg0: i32, %arg1: i32) -> (i32, i32, i32) {
    %c0_i32 = arith.constant 0 : i32
    %c0_i32_0 = arith.constant 0 : i32
    return %arg0, %arg1, %c0_i32 : i32, i32, i32
  }
}

</mosaic_0001>

<bundles_post_ra>
// kernel: tpu_custom_call.1
= control target key start
LH: loop header
LB: loop body
LE: loop exit
PB: predicated region body
PF: predicated region fallthrough
CT: control target
= control target key end

     0   :  { %s3455_s0 = inlined_call_operand.hbm [shape: bf16[2,64,256], index: 0, kind: input, shape index: {}]   ;;  %s3456_s1 = inlined_call_operand.hbm [shape: bf16[256,256], index: 1, kind: input, shape index: {}]   ;;  %s3457_s2 = inlined_call_operand.hbm [shape: bf16[256,256], index: 2, kind: input, shape index: {}]   ;;  %s3458_s3 = inlined_call_operand.hbm [shape: bf16[256,256], index: 3, kind: input, shape index: {}]   ;;  %s3459_s4 = inlined_call_operand.vmem [shape: f32[1,256], index: 4, kind: input, shape index: {}]   ;;  %s3460_s5 = inlined_call_operand.vmem [shape: f32[1,256], index: 5, kind: input, shape index: {}]   ;;  %s3461_s6 = inlined_call_operand.hbm [shape: f32[1,256], index: 6, kind: input, shape index: {}]   ;;  %s3462_s7 = inlined_call_operand.hbm [shape: bf16[256,256], index: 7, kind: input, shape index: {}]   ;;  %s3463_s8 = inlined_call_operand.vmem [shape: f32[1,256], index: 8, kind: input, shape index: {}]   ;;  %s3464_s9 = inlined_call_operand.hbm [shape: f32[2,64,256], index: 9, kind: output, shape index: {}]  }
   0x1   :  { %3475 = sst [smem:[#allocation27_spill]] %s3456_s1 }
   0x2   :  { %3476 = sst [smem:[#allocation28_spill]] %s3457_s2 }
   0x3   :  { %3477 = sst [smem:[#allocation29_spill]] %s3458_s3 }
   0x4   :  { %3478 = sst [smem:[#allocation30_spill]] %s3461_s6 }
   0x5   :  { %3479 = sst [smem:[#allocation31_spill]] %s3462_s7 }
   0x6   :  { %3480 = sst [smem:[#allocation32_spill]] %s3464_s9 }
   0x7   :  { %14 = vsyncpa [#allocation6], 0 }
   0x8   :  { %16 = vsyncpa [#allocation6 + $0x1], 0 }
   0x9   :  { %17 = vsyncpa [#allocation9], 0 }
   0xa   :  { %18 = vsyncpa [#allocation12], 0 }
   0xb   :  { %19 = vsyncpa [#allocation15], 0 }
   0xc   :  { %20 = vsyncpa [#allocation7], 0 }
   0xd   :  { %22 = vsyncpa [#allocation7 + $0x1], 0  ;;  %s3134_s30 = smov 0   ;;  %s3136_s10 = smov 0  }
   0xe   :  { %s3138_s11 = smov 0   ;;  %s3140_s12 = smov 0  }
   0xf   :  { %s3142_s13 = smov 0   ;;  %s3144_s14 = smov 0  }
  0x10   :  { %s3146_s15 = smov 0   ;;  %s3148_s16 = smov 0  }
  0x11 LB: > { %3481 = sst [smem:[#allocation22_spill]] %s3040_s30  ;;  %s3465_s17 = sadd.s32 4294967295, %s3068_s16   ;;  %s3068_s16 = sphi %s3148_s16, %s28_s16   ;;  %s3064_s15 = sphi %s3146_s15, %s3513_s15   ;;  %s3060_s14 = sphi %s3144_s14, %s3512_s14   ;;  %s3056_s13 = sphi %s3142_s13, %s3511_s13   ;;  %s3052_s12 = sphi %s3140_s12, %s3510_s12   ;;  %s3048_s11 = sphi %s3138_s11, %s3509_s11   ;;  %s3044_s10 = sphi %s3136_s10, %s3508_s10   ;;  %s3040_s30 = sphi %s3134_s30, %s3507_s30  }
  0x12   : > { %3482 = sst [smem:[#allocation23_spill]] %s3068_s16  ;;  %p1896_p0 = scmp.ge.s32.totalorder %s3068_s16, 1 }
  0x13   : > { %p3178_p1 = scmp.eq.s32.totalorder %s3465_s17, 0  ;;  %p269_p2 = scmp.lt.s32.totalorder %s3068_s16, 9 }
  0x14   : > { %s3484_s1 = sld [smem:[#allocation27_spill]]  ;;  %s3074_s23 = smov [#allocation8]  }
  0x15   : > { %p3186_p3 = pnand %p1896_p0, %p269_p2  ;;  %s282_s24 = sshll.u32 %s3074_s23, 4  ;;  %s283_s24 = int_to_ptr.vmem [resolvable:$true] %s282_s24 }
  0x16   : > { %s3487_s3 = sld [smem:[#allocation29_spill]]  ;;  %s3467_s29 = smov 128  }
  0x17   : > { %p2656_p4 = pneg %p3186_p3  ;;  %s3468_s19 = smov 8  }
  0x18   : > { %s3077_s20 = smov [#allocation11]   ;;  %s3488_s2 = sld [smem:[#allocation28_spill]] }
  0x19   : > { %p3194_p5 = pnand %p2656_p4, %p3178_p1  ;;  %s310_s23 = sshll.u32 %s3077_s20, 4  ;;  %s311_s23 = int_to_ptr.vmem [resolvable:$true] %s310_s23 }
  0x1a   : > { %s280_s21 = sshll.u32 %s3484_s1, 4  ;;  %s3489_s6 = sld [smem:[#allocation30_spill]]  ;;  %s281_s21 = int_to_ptr.hbm [resolvable:$true] %s280_s21 }
  0x1b   : > { %2659 = dma.hbm_to_vmem [thread:$0]  (!%p3194_p5), %s281_s21, 4096, %s283_s24, [#allocation9], %s3467_s29, %s3467_s29, %s3468_s19  }
  0x1c   : > { %s308_s28 = sshll.u32 %s3487_s3, 4  ;;  %s3078_s21 = smov [#allocation10]   ;;  %s309_s28 = int_to_ptr.hbm [resolvable:$true] %s308_s28 }
  0x1d   : > { %2665 = dma.hbm_to_vmem [thread:$0]  (!%p3194_p5), %s309_s28, 4096, %s311_s23, [#allocation12], %s3467_s29, %s3467_s29, %s3468_s19  }
  0x1e   : > { %s294_s9 = sshll.u32 %s3488_s2, 4  ;;  %s296_s24 = sshll.u32 %s3078_s21, 4  ;;  %s295_s9 = int_to_ptr.hbm [resolvable:$true] %s294_s9  ;;  %s297_s24 = int_to_ptr.vmem [resolvable:$true] %s296_s24 }
  0x1f   : > { %2662 = dma.hbm_to_vmem [thread:$0]  (!%p3194_p5), %s295_s9, 4096, %s297_s24, [#allocation9], %s3467_s29, %s3467_s29, %s3468_s19  }
  0x20   : > { %s329_s3 = sshll.u32 %s3489_s6, 4  ;;  %s3079_s1 = smov [#allocation13]   ;;  %s330_s3 = int_to_ptr.hbm [resolvable:$true] %s329_s3 }
  0x21   : > { %s331_s17 = sshll.u32 %s3079_s1, 4  ;;  %s3490_s7 = sld [smem:[#allocation31_spill]]  ;;  %s332_s17 = int_to_ptr.vmem [resolvable:$true] %s331_s17 }
  0x22   : > { %2668 = dma.hbm_to_vmem [thread:$0]  (!%p3194_p5), %s330_s3, 32, %s332_s17, [#allocation12]  }
  0x23   : > { %s3080_s26 = smov [#allocation14]   ;;  %s1895_s27 = sadd.s32 4294967294, %s3068_s16  }
  0x24   : > { %s342_s9 = sshll.u32 %s3080_s26, 4  ;;  %s37_s21 = sadd.s32 1, %s3060_s14  ;;  %s343_s9 = int_to_ptr.vmem [resolvable:$true] %s342_s9 }
  0x25   : > { %p38_p6 = scmp.ge.s32.totalorder %s37_s21, 4  ;;  %s40_s24 = sadd.s32 1, %s3064_s15 }
  0x26   : > { %s49_s3 = sadd.s32 1, %s3048_s11  ;;  %p56_p7 = scmp.ne.s32.totalorder %s3048_s11, %s3044_s10 }
  0x27   : > { %s340_s23 = sshll.u32 %s3490_s7, 4  ;;  %s3515_s21 = smov (%p38_p6, %s37_s21), 0  ;;  %s341_s23 = int_to_ptr.hbm [resolvable:$true] %s340_s23 }
  0x28   : > { %2671 = dma.hbm_to_vmem [thread:$0]  (!%p3194_p5), %s341_s23, 4096, %s343_s9, [#allocation15], %s3467_s29, %s3467_s29, %s3468_s19  }
  0x29   : > { %3491 = sst [smem:[#allocation24_spill]] %s3515_s21  ;;  %s3517_s24 = smov (!%p38_p6, %s40_s24), %s3064_s15 }
  0x2a   : > { %s45_s25 = ssub.s32 %s3060_s14, %s3515_s21  ;;  %p57_p8 = scmp.eq.s32.totalorder %s3068_s16, 0 }
  0x2b   : > { %p42_p9 = scmp.ge.s32.totalorder %s3517_s24, 2  ;;  %p62_p10 = scmp.ne.s32.totalorder %s3044_s10, %s3040_s30 }
  0x2c   : > { %s3492_s1 = sadd.s32 4294967295, %s3068_s16   ;;  %p262_p12 = scmp.eq.s32.totalorder %s1895_s27, 7 }
  0x2d   : > { %p256_p11 = scmp.eq.s32.totalorder %s3492_s1, 7  ;;  %s3519_s24 = smov (%p42_p9, %s3517_s24), 0 }
  0x2e   : > { %3493 = sst [smem:[#allocation25_spill]] %s3519_s24  ;;  %p3252_p13 = por %p3178_p1, %p62_p10 }
  0x2f   : > { %p3259_p0 = por %p256_p11, %p56_p7  ;;  %s44_s20 = ssub.s32 %s3064_s15, %s3519_s24 }
  0x30   : > { %p3265_p2 = por %p262_p12, %p62_p10  ;;  %s46_s26 = sor.u32 %s45_s25, %s44_s20 }
  0x31   : > { %p58_p4 = por %p57_p8, %p56_p7  ;;  %p47_p5 = scmp.eq.s32.totalorder %s46_s26, 0 }
  0x32   : > { %s3496_s23 = scalar_select %p3265_p2, 1, 0 }
  0x33   : > { %s359_s9 = sand.u32 1, %s3048_s11   ;;  %p2685_p6 = scmp.lt.s32.totalorder %s3068_s16, 8 }
  0x34   : > { %3497 = sst [smem:[#allocation26_spill]] %s3496_s23  ;;  %s1903_s27 = sshll.u32 %s359_s9, 4 }
  0x35   : > { %s3275_s1 = scalar_select %p47_p5, %s3048_s11, %s49_s3  }
  0x36   : > { %s2474_s29 = sshll.u32 %s3060_s14, 2  ;;  %s1906_s19 = sshll.u32 %s3064_s15, 4 }
  0x37   : > { %s363_s2 = scalar_lea.vmem [#allocation5], %s1903_s27  ;;  %s369_s7 = sadd.s32 %s2474_s29, %s1906_s19 }
  0x38   : > { %s374_s6 = sshll.u32 %s363_s2, 4  ;;  %s1907_s21 = sshll.u32 %s369_s7, 2  ;;  %s375_s6 = int_to_ptr.vmem [resolvable:$true] %s374_s6 }
  0x39   : > { %p2673_p9 = pnand %p2685_p6, %p58_p4  ;;  %s371_s23 = scalar_lea.hbm %s3455_s0, %s1907_s21 }
  0x3a   : > { %s372_s25 = sshll.u32 %s371_s23, 4  ;;  %s360_s20 = scalar_lea.sflag [#allocation6], %s359_s9  ;;  %s373_s25 = int_to_ptr.hbm [resolvable:$true] %s372_s25 }
  0x3b   : > { %s3498_s26 = smov 8   ;;  %s3499_s16 = smov 128  }
  0x3c   : > { %2675 = dma.hbm_to_vmem [thread:$0]  (!%p2673_p9), %s373_s25, 256, %s375_s6, %s360_s20, %s3499_s16, %s3499_s16, %s3498_s26  }
  0x3d   : > { %386 = sbr.rel (%p3186_p3) target bundleno = 806 (0x326), region = 56  ;;  %s3288_s2 = sand.u32 (!%p3186_p3), 1, %s3044_s10  }
  0x3e   : > { %s1909_s7 = sshll.u32 (!%p3186_p3), %s3288_s2, 4  ;;  %s389_s30 = scalar_lea.sflag (!%p3186_p3), [#allocation6], %s3288_s2 }
  0x3f   : > { %s3292_s29 = scalar_lea.vmem (!%p3186_p3), [#allocation5], %s1909_s7 }
  0x42   : > { %3019 = dma.done.wait (%p3252_p13), %s389_s30, 256  }
  0x43   : > { %3021 = vsyncadd (%p3252_p13), %s389_s30, 4294967040 }
  0x44   : > { %3023 = dma.done.wait (%p3178_p1), [#allocation9], 8192  }
  0x45   : > { %3025 = vsyncadd (%p3178_p1), [#allocation9], 4294959104 }
  0x46   : > { %3027 = dma.done.wait (%p3178_p1), [#allocation12], 4128  }
  0x47   : > { %3029 = vsyncadd (%p3178_p1), [#allocation12], 4294963168 }
  0x48   : > { %3031 = dma.done.wait (%p3178_p1), [#allocation15], 4096  }
  0x49   : > { %3033 = vsyncadd (%p3178_p1), [#allocation15], 4294963200  ;;  %s1915_s6 = sshll.u32 %s3288_s2, 5  ;;  %v3081_v0 = vmov 0.0   ;;  %v1983_v1 = vld [vmem:[#allocation8 + $0x70] sm:$0xf] }
  0x4a   : > { %1278 = vst [vmem:[#allocation4 + $0x10] sm:$0xff] %v3081_v0  ;;  %v2492_v2 = vld [vmem:[#allocation8 + $0x74] sm:$0xf0]  ;;  %v2047_v3 = vld [vmem:[#allocation8 + $0xf0] sm:$0xf]  ;;  %s1288_s16 = sadd.s32 1, %s3052_s12 }
  0x4b   : > { %1279 = vst [vmem:[#allocation4] sm:$0xff] %v3081_v0  ;;  %v1984_v4 = vor.u32 %v2492_v2, %v1983_v1  ;;  %v2508_v5 = vld [vmem:[#allocation8 + $0xf4] sm:$0xf0]  ;;  %v2491_v6 = vld [vmem:[#allocation8 + $0x74] sm:$0xf]  ;;  %s1916_s19 = sshll.u32 %s3052_s12, 4 }
  0x4c   : > { %1280 = vst [vmem:[#allocation4 + $0x18] sm:$0xff] %v3081_v0  ;;  %v1985_v7 = vld [vmem:[#allocation8 + $0x78] sm:$0xf0]  ;;  %v2048_v8 = vor.u32 %v2508_v5, %v2047_v3  ;;  %v2507_v10 = vld [vmem:[#allocation8 + $0xf4] sm:$0xf]  ;;  %s3364_s3 = sshra.s32 %s1916_s19, 3 }
  0x4d   : > { %1281 = vst [vmem:[#allocation4 + $0x8] sm:$0xff] %v3081_v0  ;;  %v1988_v9 = vor.u32 %v2491_v6, %v1985_v7  ;;  %v2049_v11 = vld [vmem:[#allocation8 + $0xf8] sm:$0xf0]  ;;  %v1975_v12 = vld [vmem:[#allocation8 + $0x60] sm:$0xf]  ;;  %667 = vmatpush.bf16.msra.mxu0 %v1984_v4  ;;  %s2309_s17 = sshll.u32 %s3364_s3, 2 }
  0x4e   : > { %v2052_v13 = vor.u32 %v2507_v10, %v2049_v11  ;;  %v2490_v14 = vld [vmem:[#allocation8 + $0x64] sm:$0xf0]  ;;  %v2039_v15 = vld [vmem:[#allocation8 + $0xe0] sm:$0xf]  ;;  %681 = vmatpush.bf16.msra.mxu1 %v2048_v8  ;;  %v2489_v19 = vld [vmem:[#allocation8 + $0x64] sm:$0xf] }
  0x4f   : > { %v2506_v16 = vld [vmem:[#allocation8 + $0xe4] sm:$0xf0]  ;;  %695 = vmatpush.bf16.msra.mxu2 %v1988_v9  ;;  %v1976_v17 = vor.u32 %v2490_v14, %v1975_v12  ;;  %v1977_v20 = vld [vmem:[#allocation8 + $0x68] sm:$0xf0]  ;;  %v2505_v21 = vld [vmem:[#allocation8 + $0xe4] sm:$0xf] }
  0x50   : > { %v2040_v18 = vor.u32 %v2506_v16, %v2039_v15  ;;  %709 = vmatpush.bf16.msra.mxu3 %v2052_v13  ;;  %v1980_v22 = vor.u32 %v2489_v19, %v1977_v20  ;;  %v2041_v23 = vld [vmem:[#allocation8 + $0xe8] sm:$0xf0]  ;;  %v1967_v24 = vld [vmem:[#allocation8 + $0x50] sm:$0xf]  ;;  %v2488_v25 = vld [vmem:[#allocation8 + $0x54] sm:$0xf0] }
  0x51   : > { %v2044_v26 = vor.u32 %v2505_v21, %v2041_v23  ;;  %v2031_v27 = vld [vmem:[#allocation8 + $0xd0] sm:$0xf]  ;;  %v2504_v28 = vld [vmem:[#allocation8 + $0xd4] sm:$0xf0]  ;;  %v2487_v29 = vld [vmem:[#allocation8 + $0x54] sm:$0xf]  ;;  %668 = vmatpush.bf16.msra.mxu0 %v1976_v17  ;;  %v1968_v30 = vor.u32 %v2488_v25, %v1967_v24 }
  0x52   : > { %v1969_v31 = vld [vmem:[#allocation8 + $0x58] sm:$0xf0]  ;;  %v2503_v32 = vld [vmem:[#allocation8 + $0xd4] sm:$0xf]  ;;  %682 = vmatpush.bf16.msra.mxu1 %v2040_v18  ;;  %v2032_v34 = vor.u32 %v2504_v28, %v2031_v27  ;;  %v1959_v36 = vld [vmem:[#allocation8 + $0x40] sm:$0xf] }
  0x53   : > { %v2033_v33 = vld [vmem:[#allocation8 + $0xd8] sm:$0xf0]  ;;  %696 = vmatpush.bf16.msra.mxu2 %v1980_v22  ;;  %v1972_v35 = vor.u32 %v2487_v29, %v1969_v31  ;;  %v2486_v37 = vld [vmem:[#allocation8 + $0x44] sm:$0xf0]  ;;  %v2023_v38 = vld [vmem:[#allocation8 + $0xc0] sm:$0xf] }
  0x54   : > { %710 = vmatpush.bf16.msra.mxu3 %v2044_v26  ;;  %v2036_v39 = vor.u32 %v2503_v32, %v2033_v33  ;;  %v2502_v40 = vld [vmem:[#allocation8 + $0xc4] sm:$0xf0]  ;;  %v2485_v41 = vld [vmem:[#allocation8 + $0x44] sm:$0xf]  ;;  %v1961_v42 = vld [vmem:[#allocation8 + $0x48] sm:$0xf0]  ;;  %v1960_v45 = vor.u32 %v2486_v37, %v1959_v36 }
  0x55   : > { %v2501_v43 = vld [vmem:[#allocation8 + $0xc4] sm:$0xf]  ;;  %v2025_v44 = vld [vmem:[#allocation8 + $0xc8] sm:$0xf0]  ;;  %669 = vmatpush.bf16.msra.mxu0 %v1968_v30  ;;  %v2024_v46 = vor.u32 %v2502_v40, %v2023_v38  ;;  %v1964_v47 = vor.u32 %v2485_v41, %v1961_v42  ;;  %v1951_v48 = vld [vmem:[#allocation8 + $0x30] sm:$0xf] }
  0x56   : > { %683 = vmatpush.bf16.msra.mxu1 %v2032_v34  ;;  %v2484_v49 = vld [vmem:[#allocation8 + $0x34] sm:$0xf0]  ;;  %v2015_v50 = vld [vmem:[#allocation8 + $0xb0] sm:$0xf]  ;;  %v2028_v51 = vor.u32 %v2501_v43, %v2025_v44  ;;  %v2483_v53 = vld [vmem:[#allocation8 + $0x34] sm:$0xf] }
  0x57   : > { %697 = vmatpush.bf16.msra.mxu2 %v1972_v35  ;;  %v2500_v52 = vld [vmem:[#allocation8 + $0xb4] sm:$0xf0]  ;;  %v1953_v54 = vld [vmem:[#allocation8 + $0x38] sm:$0xf0]  ;;  %v2499_v55 = vld [vmem:[#allocation8 + $0xb4] sm:$0xf]  ;;  %v1952_v57 = vor.u32 %v2484_v49, %v1951_v48 }
  0x58   : > { %711 = vmatpush.bf16.msra.mxu3 %v2036_v39  ;;  %v2017_v56 = vld [vmem:[#allocation8 + $0xb8] sm:$0xf0]  ;;  %v2016_v58 = vor.u32 %v2500_v52, %v2015_v50  ;;  %v1956_v59 = vor.u32 %v2483_v53, %v1953_v54  ;;  %v1943_v60 = vld [vmem:[#allocation8 + $0x20] sm:$0xf]  ;;  %v2482_v61 = vld [vmem:[#allocation8 + $0x24] sm:$0xf0] }
  0x59   : > { %670 = vmatpush.bf16.msra.mxu0 %v1960_v45  ;;  %v2007_v62 = vld [vmem:[#allocation8 + $0xa0] sm:$0xf]  ;;  %v2020_v63 = vor.u32 %v2499_v55, %v2017_v56  ;;  %v2498_v0 = vld [vmem:[#allocation8 + $0xa4] sm:$0xf0]  ;;  %v2481_v1 = vld [vmem:[#allocation8 + $0x24] sm:$0xf]  ;;  %v1944_v5 = vor.u32 %v2482_v61, %v1943_v60 }
  0x5a   : > { %684 = vmatpush.bf16.msra.mxu1 %v2024_v46  ;;  %v1945_v2 = vld [vmem:[#allocation8 + $0x28] sm:$0xf0]  ;;  %v2497_v3 = vld [vmem:[#allocation8 + $0xa4] sm:$0xf]  ;;  %v2008_v6 = vor.u32 %v2498_v0, %v2007_v62  ;;  %v1935_v8 = vld [vmem:[#allocation8 + $0x10] sm:$0xf] }
  0x5b   : > { %698 = vmatpush.bf16.msra.mxu2 %v1964_v47  ;;  %v2009_v4 = vld [vmem:[#allocation8 + $0xa8] sm:$0xf0]  ;;  %v1948_v7 = vor.u32 %v2481_v1, %v1945_v2  ;;  %v2480_v9 = vld [vmem:[#allocation8 + $0x14] sm:$0xf0]  ;;  %v1999_v10 = vld [vmem:[#allocation8 + $0x90] sm:$0xf] }
  0x5c   : > { %712 = vmatpush.bf16.msra.mxu3 %v2028_v51  ;;  %v2012_v11 = vor.u32 %v2497_v3, %v2009_v4  ;;  %v2496_v12 = vld [vmem:[#allocation8 + $0x94] sm:$0xf0]  ;;  %v2479_v13 = vld [vmem:[#allocation8 + $0x14] sm:$0xf]  ;;  %v1937_v14 = vld [vmem:[#allocation8 + $0x18] sm:$0xf0]  ;;  %v1936_v17 = vor.u32 %v2480_v9, %v1935_v8 }
  0x5d   : > { %671 = vmatpush.bf16.msra.mxu0 %v1952_v57  ;;  %v2495_v15 = vld [vmem:[#allocation8 + $0x94] sm:$0xf]  ;;  %v2001_v16 = vld [vmem:[#allocation8 + $0x98] sm:$0xf0]  ;;  %v1927_v18 = vld [vmem:[#allocation8] sm:$0xf]  ;;  %v2000_v20 = vor.u32 %v2496_v12, %v1999_v10  ;;  %v1940_v21 = vor.u32 %v2479_v13, %v1937_v14 }
  0x5e   : > { %685 = vmatpush.bf16.msra.mxu1 %v2016_v58  ;;  %v2478_v19 = vld [vmem:[#allocation8 + $0x4] sm:$0xf0]  ;;  %v1991_v22 = vld [vmem:[#allocation8 + $0x80] sm:$0xf]  ;;  %v2477_v24 = vld [vmem:[#allocation8 + $0x4] sm:$0xf]  ;;  %v2004_v25 = vor.u32 %v2495_v15, %v2001_v16 }
  0x5f   : > { %699 = vmatpush.bf16.msra.mxu2 %v1956_v59  ;;  %v2494_v23 = vld [vmem:[#allocation8 + $0x84] sm:$0xf0]  ;;  %v1929_v26 = vld [vmem:[#allocation8 + $0x8] sm:$0xf0]  ;;  %v2493_v27 = vld [vmem:[#allocation8 + $0x84] sm:$0xf]  ;;  %v1928_v32 = vor.u32 %v2478_v19, %v1927_v18 }
  0x60   : > { %713 = vmatpush.bf16.msra.mxu3 %v2020_v63  ;;  %v1993_v28 = vld [vmem:[#allocation8 + $0x88] sm:$0xf0]  ;;  %v2111_v29 = vld [vmem:[#allocation10 + $0x70] sm:$0xf]  ;;  %v2524_v30 = vld [vmem:[#allocation10 + $0x74] sm:$0xf0]  ;;  %v1992_v36 = vor.u32 %v2494_v23, %v1991_v22  ;;  %v1932_v37 = vor.u32 %v2477_v24, %v1929_v26 }
  0x61   : > { %672 = vmatpush.bf16.msra.mxu0 %v1944_v5  ;;  %v2175_v31 = vld [vmem:[#allocation10 + $0xf0] sm:$0xf]  ;;  %v2540_v33 = vld [vmem:[#allocation10 + $0xf4] sm:$0xf0]  ;;  %v2523_v34 = vld [vmem:[#allocation10 + $0x74] sm:$0xf]  ;;  %v1996_v40 = vor.u32 %v2493_v27, %v1993_v28  ;;  %v2112_v41 = vor.u32 %v2524_v30, %v2111_v29 }
  0x62   : > { %686 = vmatpush.bf16.msra.mxu1 %v2008_v6  ;;  %v2113_v35 = vld [vmem:[#allocation10 + $0x78] sm:$0xf0]  ;;  %v2539_v38 = vld [vmem:[#allocation10 + $0xf4] sm:$0xf]  ;;  %v2176_v42 = vor.u32 %v2540_v33, %v2175_v31  ;;  %v2103_v44 = vld [vmem:[#allocation10 + $0x60] sm:$0xf] }
  0x63   : > { %700 = vmatpush.bf16.msra.mxu2 %v1948_v7  ;;  %v2177_v39 = vld [vmem:[#allocation10 + $0xf8] sm:$0xf0]  ;;  %v2116_v43 = vor.u32 %v2523_v34, %v2113_v35  ;;  %v2522_v45 = vld [vmem:[#allocation10 + $0x64] sm:$0xf0]  ;;  %v2167_v46 = vld [vmem:[#allocation10 + $0xe0] sm:$0xf] }
  0x64   : > { %714 = vmatpush.bf16.msra.mxu3 %v2012_v11  ;;  %v2180_v47 = vor.u32 %v2539_v38, %v2177_v39  ;;  %v2538_v48 = vld [vmem:[#allocation10 + $0xe4] sm:$0xf0]  ;;  %v2521_v49 = vld [vmem:[#allocation10 + $0x64] sm:$0xf]  ;;  %v2105_v50 = vld [vmem:[#allocation10 + $0x68] sm:$0xf0]  ;;  %v2104_v53 = vor.u32 %v2522_v45, %v2103_v44 }
  0x65   : > { %673 = vmatpush.bf16.msra.mxu0 %v1936_v17  ;;  %v2537_v51 = vld [vmem:[#allocation10 + $0xe4] sm:$0xf]  ;;  %v2169_v52 = vld [vmem:[#allocation10 + $0xe8] sm:$0xf0]  ;;  %v2095_v54 = vld [vmem:[#allocation10 + $0x50] sm:$0xf]  ;;  %v2168_v56 = vor.u32 %v2538_v48, %v2167_v46  ;;  %v2108_v57 = vor.u32 %v2521_v49, %v2105_v50 }
  0x66   : > { %687 = vmatpush.bf16.msra.mxu1 %v2000_v20  ;;  %v2520_v55 = vld [vmem:[#allocation10 + $0x54] sm:$0xf0]  ;;  %v2159_v58 = vld [vmem:[#allocation10 + $0xd0] sm:$0xf]  ;;  %v2172_v61 = vor.u32 %v2537_v51, %v2169_v52  ;;  %v2519_v62 = vld [vmem:[#allocation10 + $0x54] sm:$0xf] }
  0x67   : > { %701 = vmatpush.bf16.msra.mxu2 %v1940_v21  ;;  %v2536_v59 = vld [vmem:[#allocation10 + $0xd4] sm:$0xf0]  ;;  %v1919_v60 = vld [vmem:[%s3292_s29] sm:$0xf]  ;;  %v2097_v63 = vld [vmem:[#allocation10 + $0x58] sm:$0xf0]  ;;  %v2096_v4 = vor.u32 %v2520_v55, %v2095_v54 }
  0x68   : > { %715 = vmatpush.bf16.msra.mxu3 %v2004_v25  ;;  %v2476_v0 = vld [vmem:[%s3292_s29 + $0x4] sm:$0xf0]  ;;  %v2535_v1 = vld [vmem:[#allocation10 + $0xd4] sm:$0xf]  ;;  %v2161_v2 = vld [vmem:[#allocation10 + $0xd8] sm:$0xf0]  ;;  %v2160_v7 = vor.u32 %v2536_v59, %v2159_v58  ;;  %v2100_v8 = vor.u32 %v2519_v62, %v2097_v63 }
  0x69   : > { %674 = vmatpush.bf16.msra.mxu0 %v1928_v32  ;;  %v3313_v3 = vor.u32 %v2476_v0, %v1919_v60  ;;  %v2087_v5 = vld [vmem:[#allocation10 + $0x40] sm:$0xf]  ;;  %v2518_v6 = vld [vmem:[#allocation10 + $0x44] sm:$0xf0]  ;;  %v2475_v10 = vld [vmem:[%s3292_s29 + $0x4] sm:$0xf]  ;;  %v2164_v12 = vor.u32 %v2535_v1, %v2161_v2 }
  0x6a   : > { %688 = vmatpush.bf16.msra.mxu1 %v1992_v36  ;;  %v2151_v9 = vld [vmem:[#allocation10 + $0xc0] sm:$0xf]  ;;  %v1921_v11 = vld [vmem:[%s3292_s29 + $0x8] sm:$0xf0]  ;;  %v2534_v13 = vld [vmem:[#allocation10 + $0xc4] sm:$0xf0]  ;;  %v2088_v19 = vor.u32 %v2518_v6, %v2087_v5 }
  0x6b   : > { %702 = vmatpush.bf16.msra.mxu2 %v1932_v37  ;;  %v2517_v14 = vld [vmem:[#allocation10 + $0x44] sm:$0xf]  ;;  %v2089_v15 = vld [vmem:[#allocation10 + $0x48] sm:$0xf0]  ;;  %v3318_v16 = vor.u32 %v2475_v10, %v1921_v11  ;;  %v2152_v20 = vor.u32 %v2534_v13, %v2151_v9  ;;  %v2079_v22 = vld [vmem:[#allocation10 + $0x30] sm:$0xf] }
  0x6c   : > { %716 = vmatpush.bf16.msra.mxu3 %v1996_v40  ;;  %v2533_v17 = vld [vmem:[#allocation10 + $0xc4] sm:$0xf]  ;;  %v2153_v18 = vld [vmem:[#allocation10 + $0xc8] sm:$0xf0]  ;;  %675 = vmatmul.bf16.vlgmr.msra.gmra.mxu0 %v3313_v3  ;;  %v2092_v21 = vor.u32 %v2517_v14, %v2089_v15  ;;  %v2516_v23 = vld [vmem:[#allocation10 + $0x34] sm:$0xf0] }
  0x6d   : > { %929 = vmatpush.bf16.msrb.mxu0 %v2112_v41  ;;  %v2143_v24 = vld [vmem:[#allocation10 + $0xb0] sm:$0xf]  ;;  %v2156_v25 = vor.u32 %v2533_v17, %v2153_v18  ;;  %v2532_v26 = vld [vmem:[#allocation10 + $0xb4] sm:$0xf0]  ;;  %v2515_v27 = vld [vmem:[#allocation10 + $0x34] sm:$0xf]  ;;  %689 = vmatmul.bf16.vlgmr.msra.gmra.mxu1 %v3318_v16  ;;  %v2080_v31 = vor.u32 %v2516_v23, %v2079_v22 }
  0x6e   : > { %943 = vmatpush.bf16.msrb.mxu1 %v2176_v42  ;;  %703 = vmatmul.bf16.vlgmr.msra.gmra.mxu2 %v3313_v3  ;;  %v2081_v28 = vld [vmem:[#allocation10 + $0x38] sm:$0xf0]  ;;  %v2531_v29 = vld [vmem:[#allocation10 + $0xb4] sm:$0xf]  ;;  %v2144_v32 = vor.u32 %v2532_v26, %v2143_v24  ;;  %v2071_v34 = vld [vmem:[#allocation10 + $0x20] sm:$0xf] }
  0x6f   : > { %957 = vmatpush.bf16.msrb.mxu2 %v2116_v43  ;;  %717 = vmatmul.bf16.vlgmr.msra.gmra.mxu3 %v3318_v16  ;;  %v2145_v30 = vld [vmem:[#allocation10 + $0xb8] sm:$0xf0]  ;;  %v2084_v33 = vor.u32 %v2515_v27, %v2081_v28  ;;  %v2514_v35 = vld [vmem:[#allocation10 + $0x24] sm:$0xf0]  ;;  %v2135_v36 = vld [vmem:[#allocation10 + $0xa0] sm:$0xf] }
  0x70   : > { %971 = vmatpush.bf16.msrb.mxu3 %v2180_v47  ;;  %v2148_v37 = vor.u32 %v2531_v29, %v2145_v30  ;;  %v2530_v38 = vld [vmem:[#allocation10 + $0xa4] sm:$0xf0]  ;;  %v2513_v39 = vld [vmem:[#allocation10 + $0x24] sm:$0xf]  ;;  %v2073_v40 = vld [vmem:[#allocation10 + $0x28] sm:$0xf0]  ;;  %v2072_v43 = vor.u32 %v2514_v35, %v2071_v34 }
  0x71   : > { %930 = vmatpush.bf16.msrb.mxu0 %v2104_v53  ;;  %v2529_v41 = vld [vmem:[#allocation10 + $0xa4] sm:$0xf]  ;;  %v2137_v42 = vld [vmem:[#allocation10 + $0xa8] sm:$0xf0]  ;;  %v2136_v44 = vor.u32 %v2530_v38, %v2135_v36  ;;  %v2076_v45 = vor.u32 %v2513_v39, %v2073_v40  ;;  %v2063_v46 = vld [vmem:[#allocation10 + $0x10] sm:$0xf] }
  0x72   : > { %944 = vmatpush.bf16.msrb.mxu1 %v2168_v56  ;;  %v2512_v47 = vld [vmem:[#allocation10 + $0x14] sm:$0xf0]  ;;  %v2127_v48 = vld [vmem:[#allocation10 + $0x90] sm:$0xf]  ;;  %v2140_v49 = vor.u32 %v2529_v41, %v2137_v42  ;;  %v2511_v51 = vld [vmem:[#allocation10 + $0x14] sm:$0xf] }
  0x73   : > { %958 = vmatpush.bf16.msrb.mxu2 %v2108_v57  ;;  %v2528_v50 = vld [vmem:[#allocation10 + $0x94] sm:$0xf0]  ;;  %v2065_v52 = vld [vmem:[#allocation10 + $0x18] sm:$0xf0]  ;;  %v2527_v53 = vld [vmem:[#allocation10 + $0x94] sm:$0xf]  ;;  %v2064_v55 = vor.u32 %v2512_v47, %v2063_v46 }
  0x74   : > { %972 = vmatpush.bf16.msrb.mxu3 %v2172_v61  ;;  %v2129_v54 = vld [vmem:[#allocation10 + $0x98] sm:$0xf0]  ;;  %v2055_v56 = vld [vmem:[#allocation10] sm:$0xf]  ;;  %v2510_v57 = vld [vmem:[#allocation10 + $0x4] sm:$0xf0]  ;;  %v2128_v58 = vor.u32 %v2528_v50, %v2127_v48  ;;  %v2068_v59 = vor.u32 %v2511_v51, %v2065_v52 }
  0x75   : > { %931 = vmatpush.bf16.msrb.mxu0 %v2096_v4  ;;  %v2119_v60 = vld [vmem:[#allocation10 + $0x80] sm:$0xf]  ;;  %v2526_v61 = vld [vmem:[#allocation10 + $0x84] sm:$0xf0]  ;;  %v2509_v62 = vld [vmem:[#allocation10 + $0x4] sm:$0xf]  ;;  %v2132_v63 = vor.u32 %v2527_v53, %v2129_v54 }
  0x76   : > { %945 = vmatpush.bf16.msrb.mxu1 %v2160_v7  ;;  %v2057_v0 = vld [vmem:[#allocation10 + $0x8] sm:$0xf0]  ;;  %v2525_v1 = vld [vmem:[#allocation10 + $0x84] sm:$0xf]  ;;  %v2239_v4 = vld [vmem:[#allocation11 + $0x70] sm:$0xf]  ;;  %v2056_v7 = vor.u32 %v2510_v57, %v2055_v56  ;;  %v2120_v11 = vor.u32 %v2526_v61, %v2119_v60 }
  0x77   : > { %959 = vmatpush.bf16.msrb.mxu2 %v2100_v8  ;;  %v2121_v2 = vld [vmem:[#allocation10 + $0x88] sm:$0xf0]  ;;  %v2556_v5 = vld [vmem:[#allocation11 + $0x74] sm:$0xf0]  ;;  %v2303_v6 = vld [vmem:[#allocation11 + $0xf0] sm:$0xf] }
  0x78   : > { %973 = vmatpush.bf16.msrb.mxu3 %v2164_v12  ;;  %v2572_v8 = vld [vmem:[#allocation11 + $0xf4] sm:$0xf0]  ;;  %v2555_v9 = vld [vmem:[#allocation11 + $0x74] sm:$0xf]  ;;  %v2241_v10 = vld [vmem:[#allocation11 + $0x78] sm:$0xf0]  ;;  %v2060_v12 = vor.u32 %v2509_v62, %v2057_v0  ;;  %v2124_v15 = vor.u32 %v2525_v1, %v2121_v2  ;;  %v2240_v17 = vor.u32 %v2556_v5, %v2239_v4 }
  0x79   : > { %932 = vmatpush.bf16.msrb.mxu0 %v2088_v19  ;;  %v2571_v13 = vld [vmem:[#allocation11 + $0xf4] sm:$0xf]  ;;  %v2305_v14 = vld [vmem:[#allocation11 + $0xf8] sm:$0xf0]  ;;  %v2304_v18 = vor.u32 %v2572_v8, %v2303_v6  ;;  %v2244_v19 = vor.u32 %v2555_v9, %v2241_v10  ;;  %v2295_v22 = vld [vmem:[#allocation11 + $0xe0] sm:$0xf] }
  0x7a   : > { %946 = vmatpush.bf16.msrb.mxu1 %v2152_v20  ;;  %v2231_v20 = vld [vmem:[#allocation11 + $0x60] sm:$0xf]  ;;  %v2308_v23 = vor.u32 %v2571_v13, %v2305_v14  ;;  %v2570_v24 = vld [vmem:[#allocation11 + $0xe4] sm:$0xf0]  ;;  %v2233_v26 = vld [vmem:[#allocation11 + $0x68] sm:$0xf0] }
  0x7b   : > { %960 = vmatpush.bf16.msrb.mxu2 %v2092_v21  ;;  %v2554_v21 = vld [vmem:[#allocation11 + $0x64] sm:$0xf0]  ;;  %v2569_v27 = vld [vmem:[#allocation11 + $0xe4] sm:$0xf]  ;;  %v2297_v28 = vld [vmem:[#allocation11 + $0xe8] sm:$0xf0]  ;;  %v2296_v30 = vor.u32 %v2570_v24, %v2295_v22 }
  0x7c   : > { %974 = vmatpush.bf16.msrb.mxu3 %v2156_v25  ;;  %v2553_v25 = vld [vmem:[#allocation11 + $0x64] sm:$0xf]  ;;  %v2232_v29 = vor.u32 %v2554_v21, %v2231_v20  ;;  %v2287_v34 = vld [vmem:[#allocation11 + $0xd0] sm:$0xf]  ;;  %v2300_v35 = vor.u32 %v2569_v27, %v2297_v28  ;;  %v2568_v36 = vld [vmem:[#allocation11 + $0xd4] sm:$0xf0] }
  0x7d   : > { %933 = vmatpush.bf16.msrb.mxu0 %v2080_v31  ;;  %v2236_v31 = vor.u32 %v2553_v25, %v2233_v26  ;;  %v2225_v38 = vld [vmem:[#allocation11 + $0x58] sm:$0xf0]  ;;  %v2567_v39 = vld [vmem:[#allocation11 + $0xd4] sm:$0xf]  ;;  %v2288_v42 = vor.u32 %v2568_v36, %v2287_v34  ;;  %v2279_v46 = vld [vmem:[#allocation11 + $0xc0] sm:$0xf] }
  0x7e   : > { %947 = vmatpush.bf16.msrb.mxu1 %v2144_v32  ;;  %v2223_v32 = vld [vmem:[#allocation11 + $0x50] sm:$0xf]  ;;  %v2289_v40 = vld [vmem:[#allocation11 + $0xd8] sm:$0xf0]  ;;  %v2566_v48 = vld [vmem:[#allocation11 + $0xc4] sm:$0xf0] }
  0x7f   : > { %961 = vmatpush.bf16.msrb.mxu2 %v2084_v33  ;;  %v2552_v33 = vld [vmem:[#allocation11 + $0x54] sm:$0xf0]  ;;  %v2292_v47 = vor.u32 %v2567_v39, %v2289_v40  ;;  %v2217_v50 = vld [vmem:[#allocation11 + $0x48] sm:$0xf0]  ;;  %v2565_v51 = vld [vmem:[#allocation11 + $0xc4] sm:$0xf]  ;;  %v2280_v54 = vor.u32 %v2566_v48, %v2279_v46 }
  0x80   : > { %975 = vmatpush.bf16.msrb.mxu3 %v2148_v37  ;;  %v2551_v37 = vld [vmem:[#allocation11 + $0x54] sm:$0xf]  ;;  %v2224_v41 = vor.u32 %v2552_v33, %v2223_v32  ;;  %v2281_v52 = vld [vmem:[#allocation11 + $0xc8] sm:$0xf0]  ;;  %v2207_v56 = vld [vmem:[#allocation11 + $0x30] sm:$0xf] }
  0x81   : > { %934 = vmatpush.bf16.msrb.mxu0 %v2072_v43  ;;  %v2228_v43 = vor.u32 %v2551_v37, %v2225_v38  ;;  %v2548_v57 = vld [vmem:[#allocation11 + $0x34] sm:$0xf0]  ;;  %v2547_v61 = vld [vmem:[#allocation11 + $0x34] sm:$0xf]  ;;  %v2209_v62 = vld [vmem:[#allocation11 + $0x38] sm:$0xf0] }
  0x82   : > { %948 = vmatpush.bf16.msrb.mxu1 %v2136_v44  ;;  %v2215_v44 = vld [vmem:[#allocation11 + $0x40] sm:$0xf]  ;;  %v2564_v60 = vld [vmem:[#allocation11 + $0xb4] sm:$0xf0]  ;;  %v2273_v0 = vld [vmem:[#allocation11 + $0xb8] sm:$0xf0]  ;;  %v2208_v1 = vor.u32 %v2548_v57, %v2207_v56  ;;  %v2212_v4 = vor.u32 %v2547_v61, %v2209_v62  ;;  %v1285_v62 = vstv %s1916_s19 }
  0x83   : > { %962 = vmatpush.bf16.msrb.mxu2 %v2076_v45  ;;  %v2550_v45 = vld [vmem:[#allocation11 + $0x44] sm:$0xf0]  ;;  %v2199_v5 = vld [vmem:[#allocation11 + $0x20] sm:$0xf]  ;;  %v2545_v10 = vld [vmem:[#allocation11 + $0x24] sm:$0xf] }
  0x84   : > { %976 = vmatpush.bf16.msrb.mxu3 %v2140_v49  ;;  %v2549_v49 = vld [vmem:[#allocation11 + $0x44] sm:$0xf]  ;;  %v2216_v53 = vor.u32 %v2550_v45, %v2215_v44  ;;  %v2546_v6 = vld [vmem:[#allocation11 + $0x24] sm:$0xf0]  ;;  %v2265_v13 = vld [vmem:[#allocation11 + $0xa8] sm:$0xf0] }
  0x85   : > { %935 = vmatpush.bf16.msrb.mxu0 %v2064_v55  ;;  %v2220_v55 = vor.u32 %v2549_v49, %v2217_v50  ;;  %v2562_v9 = vld [vmem:[#allocation11 + $0xa4] sm:$0xf0]  ;;  %v2200_v14 = vor.u32 %v2546_v6, %v2199_v5  ;;  %v2255_v20 = vld [vmem:[#allocation11 + $0x90] sm:$0xf]  ;;  %v2560_v22 = vld [vmem:[#allocation11 + $0x94] sm:$0xf0] }
  0x86   : > { %949 = vmatpush.bf16.msrb.mxu1 %v2128_v58  ;;  %v2271_v58 = vld [vmem:[#allocation11 + $0xb0] sm:$0xf]  ;;  %v2193_v24 = vld [vmem:[#allocation11 + $0x18] sm:$0xf0]  ;;  %v2559_v25 = vld [vmem:[#allocation11 + $0x94] sm:$0xf]  ;;  %v2256_v28 = vor.u32 %v2560_v22, %v2255_v20 }
  0x87   : > { %963 = vmatpush.bf16.msrb.mxu2 %v2068_v59  ;;  %v2284_v59 = vor.u32 %v2565_v51, %v2281_v52  ;;  %v2272_v2 = vor.u32 %v2564_v60, %v2271_v58  ;;  %v2257_v26 = vld [vmem:[#allocation11 + $0x98] sm:$0xf0]  ;;  %v2247_v32 = vld [vmem:[#allocation11 + $0x80] sm:$0xf]  ;;  %v2558_v34 = vld [vmem:[#allocation11 + $0x84] sm:$0xf0] }
  0x88   : > { %977 = vmatpush.bf16.msrb.mxu3 %v2132_v63  ;;  %v2563_v63 = vld [vmem:[#allocation11 + $0xb4] sm:$0xf]  ;;  %v2260_v33 = vor.u32 %v2559_v25, %v2257_v26  ;;  %v2185_v36 = vld [vmem:[#allocation11 + $0x8] sm:$0xf0]  ;;  %v2557_v37 = vld [vmem:[#allocation11 + $0x84] sm:$0xf]  ;;  %v2248_v40 = vor.u32 %v2558_v34, %v2247_v32 }
  0x89   : > { %936 = vmatpush.bf16.msrb.mxu0 %v2056_v7  ;;  %v2263_v7 = vld [vmem:[#allocation11 + $0xa0] sm:$0xf]  ;;  %v2276_v8 = vor.u32 %v2563_v63, %v2273_v0  ;;  %v2249_v38 = vld [vmem:[#allocation11 + $0x88] sm:$0xf0]  ;;  %s1256_s23 = scalar_lea.vmem [#allocation2], %s2309_s17  ;;  %s1262_s9 = scalar_lea.vmem [#allocation3], %s2309_s17 }
  0x8a   : > { %950 = vmatpush.bf16.msrb.mxu1 %v2120_v11  ;;  %v2201_v11 = vld [vmem:[#allocation11 + $0x28] sm:$0xf0]  ;;  %s3373_s27 = scalar_lea.vmem [#allocation16], %s1915_s6  ;;  %p2317_p1 = scmp.le.s32.totalorder %s1288_s16, 0 }
  0x8b   : > { %964 = vmatpush.bf16.msrb.mxu2 %v2060_v12  ;;  %v2561_v12 = vld [vmem:[#allocation11 + $0xa4] sm:$0xf]  ;;  %s3377_s25 = smov (!%p2317_p1), 0  }
  0x8c   : > { %978 = vmatpush.bf16.msrb.mxu3 %v2124_v15  ;;  %937 = vmatmul.bf16.vlgmr.msrb.gmra.mxu0 %v3313_v3  ;;  %v2264_v15 = vor.u32 %v2562_v9, %v2263_v7  ;;  %v2268_v21 = vor.u32 %v2561_v12, %v2265_v13 }
  0x8d   : > { %1187 = vmatpush.bf16.msra.mxu0 %v2240_v17  ;;  %951 = vmatmul.bf16.vlgmr.msrb.gmra.mxu1 %v3318_v16  ;;  %v2204_v17 = vor.u32 %v2545_v10, %v2201_v11 }
  0x8e   : > { %1201 = vmatpush.bf16.msra.mxu1 %v2304_v18  ;;  %965 = vmatmul.bf16.vlgmr.msrb.gmra.mxu2 %v3313_v3  ;;  %v2191_v18 = vld [vmem:[#allocation11 + $0x10] sm:$0xf] }
  0x8f   : > { %1215 = vmatpush.bf16.msra.mxu2 %v2244_v19  ;;  %979 = vmatmul.bf16.vlgmr.msrb.gmra.mxu3 %v3318_v16  ;;  %v2544_v19 = vld [vmem:[#allocation11 + $0x14] sm:$0xf0] }
  0x90   : > { %1229 = vmatpush.bf16.msra.mxu3 %v2308_v23  ;;  %v2543_v23 = vld [vmem:[#allocation11 + $0x14] sm:$0xf]  ;;  %v2192_v27 = vor.u32 %v2544_v19, %v2191_v18 }
  0x91   : > { %1188 = vmatpush.bf16.msra.mxu0 %v2232_v29  ;;  %v2196_v29 = vor.u32 %v2543_v23, %v2193_v24 }
  0x92   : > { %1202 = vmatpush.bf16.msra.mxu1 %v2296_v30  ;;  %v2183_v30 = vld [vmem:[#allocation11] sm:$0xf] }
  0x93   : > { %1216 = vmatpush.bf16.msra.mxu2 %v2236_v31  ;;  %v2542_v31 = vld [vmem:[#allocation11 + $0x4] sm:$0xf0] }
  0x94   : > { %1230 = vmatpush.bf16.msra.mxu3 %v2300_v35  ;;  %v2541_v35 = vld [vmem:[#allocation11 + $0x4] sm:$0xf]  ;;  %v2184_v39 = vor.u32 %v2542_v31, %v2183_v30 }
  0x95   : > { %1189 = vmatpush.bf16.msra.mxu0 %v2224_v41  ;;  %v2188_v41 = vor.u32 %v2541_v35, %v2185_v36 }
  0x96   : > { %1203 = vmatpush.bf16.msra.mxu1 %v2288_v42  ;;  %v2252_v42 = vor.u32 %v2557_v37, %v2249_v38 }
  0x97   : > { %1217 = vmatpush.bf16.msra.mxu2 %v2228_v43  ;;  %v491_v43 = vld [vmem:[%s3459_s4] sm:$0x3] }
  0x98   : > { %1231 = vmatpush.bf16.msra.mxu3 %v2292_v47  ;;  %v493_v44 = vperm.slane %v491_v43, 0  ;;  %v494_v47 = vperm.slane %v491_v43, 1 }
  0x99   : > { %1190 = vmatpush.bf16.msra.mxu0 %v2216_v53 }
  0x9a   : > { %1204 = vmatpush.bf16.msra.mxu1 %v2280_v54 }
  0x9b   : > { %1218 = vmatpush.bf16.msra.mxu2 %v2220_v55 }
  0x9c   : > { %1232 = vmatpush.bf16.msra.mxu3 %v2284_v59  ;;  %v1282_v59 = vlaneseq }
  0x9d   : > { %1191 = vmatpush.bf16.msra.mxu0 %v2208_v1 }
  0x9e   : > { %1205 = vmatpush.bf16.msra.mxu1 %v2272_v2  ;;  %v1283_v0 = vshrl.u32 %v1282_v59, 7 }
  0x9f   : > { %1219 = vmatpush.bf16.msra.mxu2 %v2212_v4 }
  0xa0   : > { %1233 = vmatpush.bf16.msra.mxu3 %v2276_v8  ;;  %v1284_v6 = vadd.s32 8, %v1283_v0  ;;  %v3347_v7 = vadd.s32 %v1285_v62, %v1283_v0 }
  0xa1   : > { %1192 = vmatpush.bf16.msra.mxu0 %v2200_v14 }
  0xa2   : > { %1206 = vmatpush.bf16.msra.mxu1 %v2264_v15  ;;  %v3351_v10 = vadd.s32 %v1285_v62, %v1284_v6  ;;  %v763_v15 = vld [vmem:[%s3460_s5] sm:$0x3] }
  0xa3   : > { %1220 = vmatpush.bf16.msra.mxu2 %v2204_v17  ;;  %v765_v17 = vperm.slane %v763_v15, 0 }
  0xa4   : > { %1234 = vmatpush.bf16.msra.mxu3 %v2268_v21  ;;  %v766_v21 = vperm.slane %v763_v15, 1 }
  0xa5   : > { %1193 = vmatpush.bf16.msra.mxu0 %v2192_v27 }
  0xa6   : > { %1207 = vmatpush.bf16.msra.mxu1 %v2256_v28 }
  0xa7   : > { %1221 = vmatpush.bf16.msra.mxu2 %v2196_v29 }
  0xa8   : > { %1235 = vmatpush.bf16.msra.mxu3 %v2260_v33 }
  0xa9   : > { %1194 = vmatpush.bf16.msra.mxu0 %v2184_v39 }
  0xaa   : > { %1208 = vmatpush.bf16.msra.mxu1 %v2248_v40 }
  0xab   : > { %1222 = vmatpush.bf16.msra.mxu2 %v2188_v41  ;;  %v1021_v41 = vld [vmem:[#allocation13] sm:$0x3] }
  0xac   : > { %1236 = vmatpush.bf16.msra.mxu3 %v2252_v42  ;;  %1195 = vmatmul.bf16.vlgmr.msra.gmra.mxu0 %v3313_v3  ;;  %v1023_v43 = vperm.slane %v1021_v41, 0 }
  0xad   : > { %1209 = vmatmul.bf16.vlgmr.msra.gmra.mxu1 %v3318_v16 }
  0xae   : > { %1223 = vmatmul.bf16.vlgmr.msra.gmra.mxu2 %v3313_v3 }
  0xaf   : > { %1237 = vmatmul.bf16.vlgmr.msra.gmra.mxu3 %v3318_v16 }
  0xe9   : > { %v676_v45 = vpop.f32.mrf.mxu0 }
  0xea   : > { %v677_v46 = vadd.f32 %v676_v45, %v493_v44  ;;  %v690_v48 = vpop.f32.mrf.mxu1 }
  0xec   : > { %v691_v49 = vadd.f32 %v690_v48, %v677_v46 }
  0xee   : > { %v723_v52 = vmax.f32 %v691_v49, 0.0 }
  0xf0   : > { %v3335_v3 = vmul.f32 0.088388346, %v723_v52 }
  0xf1   : > { %v704_v50 = vpop.f32.mrf.mxu2  ;;  %v678_v54 = vpop.f32.mrf.mxu0 }
  0xf2   : > { %v705_v51 = vadd.f32 %v704_v50, %v494_v47  ;;  %v718_v53 = vpop.f32.mrf.mxu3  ;;  %v679_v55 = vadd.f32 %v678_v54, %v493_v44  ;;  %v1247_v56 = vpack.c.bf16 %v3335_v3, %v3335_v3  ;;  %v692_v58 = vpop.f32.mrf.mxu1 }
  0xf4   : > { %v719_v16 = vadd.f32 %v718_v53, %v705_v51  ;;  %v693_v61 = vadd.f32 %v692_v58, %v679_v55 }
  0xf6   : > { %v724_v57 = vmax.f32 %v719_v16, 0.0  ;;  %v725_v4 = vmax.f32 %v693_v61, 0.0 }
  0xf8   : > { %v3340_v60 = vmul.f32 0.088388346, %v724_v57  ;;  %v3349_v8 = vmul.f32 0.088388346, %v725_v4 }
  0xf9   : > { %v706_v63 = vpop.f32.mrf.mxu2 }
  0xfa   : > { %v1249_v1 = vpack.c.bf16 %v3340_v60, %v3340_v60  ;;  %v707_v2 = vadd.f32 %v706_v63, %v494_v47  ;;  %v720_v5 = vpop.f32.mrf.mxu3  ;;  %v1248_v11 = vpack.c.bf16 %v3349_v8, %v3349_v8  ;;  %v1024_v47 = vperm.slane %v1021_v41, 1 }
  0xfc   : > { %v721_v9 = vadd.f32 %v720_v5, %v707_v2 }
  0xfe   : > { %v726_v12 = vmax.f32 %v721_v9, 0.0 }
 0x100   : > { %v3355_v13 = vmul.f32 0.088388346, %v726_v12 }
 0x102   : > { %v1250_v14 = vpack.c.bf16 %v3355_v13, %v3355_v13 }
 0x109   : > { %v938_v18 = vpop.f32.mrf.mxu0 }
 0x10a   : > { %v952_v19 = vpop.f32.mrf.mxu1  ;;  %v939_v20 = vadd.f32 %v938_v18, %v765_v17 }
 0x10c   : > { %v953_v24 = vadd.f32 %v952_v19, %v939_v20 }
 0x10e   : > { %v985_v29 = vmax.f32 %v953_v24, 0.0 }
 0x111   : > { %v966_v22 = vpop.f32.mrf.mxu2  ;;  %v940_v26 = vpop.f32.mrf.mxu0 }
 0x112   : > { %v980_v23 = vpop.f32.mrf.mxu3  ;;  %v967_v25 = vadd.f32 %v966_v22, %v766_v21  ;;  %v941_v27 = vadd.f32 %v940_v26, %v765_v17  ;;  %v954_v28 = vpop.f32.mrf.mxu1 }
 0x114   : > { %v955_v30 = vadd.f32 %v954_v28, %v941_v27  ;;  %v981_v31 = vadd.f32 %v980_v23, %v967_v25 }
 0x116   : > { %v987_v33 = vmax.f32 %v955_v30, 0.0  ;;  %v986_v37 = vmax.f32 %v981_v31, 0.0 }
 0x118   : > { %v2613_v36 = vpack.c.bf16 %v987_v33, %v985_v29 }
 0x119   : > { %v968_v32 = vpop.f32.mrf.mxu2 }
 0x11a   : > { %v969_v34 = vadd.f32 %v968_v32, %v766_v21  ;;  %v982_v35 = vpop.f32.mrf.mxu3  ;;  %2614 = vst [vmem:[%s1256_s23] sm:$0xff] %v2613_v36  }
 0x11c   : > { %v983_v38 = vadd.f32 %v982_v35, %v969_v34 }
 0x11e   : > { %v988_v39 = vmax.f32 %v983_v38, 0.0 }
 0x120   : > { %v2623_v40 = vpack.c.bf16 %v988_v39, %v986_v37 }
 0x122   : > { %2630 = vst [vmem:[%s1256_s23 + $0x20] sm:$0xff] %v2623_v40  }
 0x129   : > { %v1196_v42 = vpop.f32.mrf.mxu0 }
 0x12a   : > { %v1210_v44 = vpop.f32.mrf.mxu1  ;;  %v1197_v45 = vadd.f32 %v1196_v42, %v1023_v43 }
 0x12c   : > { %v1211_v50 = vadd.f32 %v1210_v44, %v1197_v45 }
 0x12e   : > { %v1243_v54 = vmax.f32 %v1211_v50, 0.0 }
 0x131   : > { %v1224_v46 = vpop.f32.mrf.mxu2  ;;  %v1198_v49 = vpop.f32.mrf.mxu0 }
 0x132   : > { %v1238_v48 = vpop.f32.mrf.mxu3  ;;  %v1199_v51 = vadd.f32 %v1198_v49, %v1023_v43  ;;  %v1212_v52 = vpop.f32.mrf.mxu1  ;;  %v1225_v16 = vadd.f32 %v1224_v46, %v1024_v47 }
 0x134   : > { %v1213_v53 = vadd.f32 %v1212_v52, %v1199_v51  ;;  %v1239_v61 = vadd.f32 %v1238_v48, %v1225_v16 }
 0x136   : > { %v1245_v55 = vmax.f32 %v1213_v53, 0.0  ;;  %v1244_v2 = vmax.f32 %v1239_v61, 0.0 }
 0x138   : > { %v2618_v57 = vpack.c.bf16 %v1245_v55, %v1243_v54 }
 0x139   : > { %v1226_v58 = vpop.f32.mrf.mxu2 }
 0x13a   : > { %v1227_v62 = vadd.f32 %v1226_v58, %v1024_v47  ;;  %2619 = vst [vmem:[%s1262_s9] sm:$0xff] %v2618_v57   ;;  %v1240_v63 = vpop.f32.mrf.mxu3 }
 0x13c   : > { %v1241_v0 = vadd.f32 %v1240_v63, %v1227_v62 }
 0x13e   : > { %v1246_v4 = vmax.f32 %v1241_v0, 0.0  ;;  %1811 = sbr.rel (%p2317_p1) target bundleno = 623 (0x26f), region = 129 }
 0x140   : > { %v2628_v5 = vpack.c.bf16 %v1246_v4, %v1244_v2 }
 0x142   : > { %2631 = vst [vmem:[%s1262_s9 + $0x20] sm:$0xff] %v2628_v5  }
 0x143 LB: >> { %s2318_s20 = sshll.u32 %s3072_s25, 4  ;;  %v1312_v12 = vunpack.c.l.b16 %v1247_v56  ;;  %v1313_v15 = vunpack.c.l.b16 %v1248_v11  ;;  %v1338_v17 = vunpack.c.l.b16 %v1249_v1  ;;  %v1339_v18 = vunpack.c.l.b16 %v1250_v14  ;;  %v1380_v48 = vld [vmem:[#allocation4 + $0x10] sm:$0xff]  ;;  %v1382_v49 = vld [vmem:[#allocation4 + $0x18] sm:$0xff]  ;;  %v1381_v16 = vld [vmem:[#allocation4] sm:$0xff]  ;;  %s1292_s25 = sadd.s32 1, %s3072_s25   ;;  %s3072_s25 = sphi %s3377_s25, %s1292_s25  }
 0x144   : >> { %s1296_s26 = sshra.s32 %s2318_s20, 3  ;;  %v1363_v23 = vand.u32 127, %v1282_v59  ;;  %v1364_v24 = vstv %s2318_s20  ;;  %vm1399_vm2 = vcmask 130048   ;;  %v1383_v54 = vld [vmem:[#allocation4 + $0x8] sm:$0xff]  ;;  %p1291_p3 = scmp.ge.s32.totalorder %s1292_s25, %s1288_s16 }
 0x145   : >> { %s2319_s7 = sshll.u32 %s1296_s26, 2  ;;  %v1314_v19 = vpack.c.b16 %v1313_v15, %v1312_v12  ;;  %v1340_v20 = vpack.c.b16 %v1339_v18, %v1338_v17 }
 0x146   : >> { %s1299_s30 = scalar_lea.vmem [#allocation2], %s2319_s7  ;;  %s1305_s29 = scalar_lea.vmem [#allocation3], %s2319_s7  ;;  %v1365_v26 = vadd.s32 %v1364_v24, %v1363_v23 }
 0x147   : >> { %v2573_v6 = vld [vmem:[%s1299_s30] sm:$0xff] }
 0x148   : >> { %v2574_v9 = vld [vmem:[%s1299_s30 + $0x20] sm:$0xff]  ;;  %1329 = vmatpush.bf16.xpose.msra.mxu0 %v2573_v6  ;;  %vm1366_vm0 = vcmp.le.s32.totalorder %v1365_v26, %v3347_v7  ;;  %vm1367_vm1 = vcmp.le.s32.totalorder %v1365_v26, %v3351_v10 }
 0x149   : >> { %1355 = vmatpush.bf16.xpose.msra.mxu1 %v2574_v9  ;;  %v2575_v21 = vld [vmem:[%s1305_s29] sm:$0xff] }
 0x14a   : >> { %v2576_v22 = vld [vmem:[%s1305_s29 + $0x20] sm:$0xff]  ;;  %1410 = vmatpush.bf16.msra.mxu2 %v2575_v21 }
 0x14b   : >> { %1438 = vmatpush.bf16.msra.mxu3 %v2576_v22 }
 0x14f   : >> { %1330 = vmatmul.bf16.vlgmr.msra.gmra.mxu0 %v1314_v19 }
 0x150   : >> { %1356 = vmatmul.bf16.vlgmr.msra.gmra.mxu1 %v1340_v20 }
 0x1cc   : >> { %v1331_v25 = vpop.f32.mrf.mxu0 }
 0x1cd   : >> { %v1357_v27 = vpop.f32.mrf.mxu1  ;;  %v1368_v28 = vmax.f32 %v1331_v25, 0.0 }
 0x1ce   : >> { %v1370_v29 = vmax.f32 %v1357_v27, 0.0 }
 0x1cf   : >> { %v1376_v30 = vsel %vm1366_vm0, %v1368_v28, 0.0 }
 0x1d0   : >> { %v1378_v31 = vsel %vm1366_vm0, %v1370_v29, 0.0  ;;  %v1384_v36 = vpack.c.bf16 %v1376_v30, %v1376_v30 }
 0x1d1   : >> { %v1386_v37 = vpack.c.bf16 %v1378_v31, %v1378_v31 }
 0x1d2   : >> { %v1390_v42 = vunpack.c.l.b16 %v1384_v36 }
 0x1d3   : >> { %v1419_v43 = vunpack.c.l.b16 %v1386_v37 }
 0x1d4   : >> { %v1333_v32 = vpop.f32.mrf.mxu0 }
 0x1d5   : >> { %v1359_v33 = vpop.f32.mrf.mxu1  ;;  %v1369_v34 = vmax.f32 %v1333_v32, 0.0 }
 0x1d6   : >> { %v1371_v35 = vmax.f32 %v1359_v33, 0.0 }
 0x1d7   : >> { %v1377_v38 = vsel %vm1367_vm1, %v1369_v34, 0.0 }
 0x1d8   : >> { %v1379_v39 = vsel %vm1367_vm1, %v1371_v35, 0.0  ;;  %v1385_v40 = vpack.c.bf16 %v1377_v38, %v1377_v38 }
 0x1d9   : >> { %v1387_v41 = vpack.c.bf16 %v1379_v39, %v1379_v39 }
 0x1da   : >> { %v1391_v44 = vunpack.c.l.b16 %v1385_v40 }
 0x1db   : >> { %v1420_v45 = vunpack.c.l.b16 %v1387_v41 }
 0x1dc   : >> { %v1392_v46 = vpack.c.b16 %v1391_v44, %v1390_v42 }
 0x1dd   : >> { %v1421_v47 = vpack.c.b16 %v1420_v45, %v1419_v43 }
 0x1de   : >> { %2333 = vmatmul.msk.bf16.vlgmr.msra.gmra.mxu2 %vm1399_vm2, %v1392_v46 }
 0x1df   : >> { %2338 = vmatmul.msk.bf16.vlgmr.msra.gmra.mxu3 %vm1399_vm2, %v1421_v47 }
 0x261   : >> { %v1412_v50 = vpop.f32.mrf.mxu2 }
 0x262   : >> { %v1440_v51 = vpop.f32.mrf.mxu3  ;;  %v1445_v52 = vadd.f32 %v1412_v50, %v1380_v48 }
 0x263   : >> { %v1447_v53 = vadd.f32 %v1440_v51, %v1382_v49 }
 0x264   : >> { %1449 = vst [vmem:[#allocation4 + $0x10] sm:$0xff] %v1445_v52 }
 0x265   : >> { %1451 = vst [vmem:[#allocation4 + $0x18] sm:$0xff] %v1447_v53 }
 0x269   : >> { %v1414_v55 = vpop.f32.mrf.mxu2 }
 0x26a   : >> { %v1442_v57 = vpop.f32.mrf.mxu3  ;;  %v1446_v58 = vadd.f32 %v1414_v55, %v1381_v16  ;;  %1294 = sbr.rel (!%p1291_p3) target bundleno = 323 (0x143), region = 135 }
 0x26b   : >> { %v1448_v61 = vadd.f32 %v1442_v57, %v1383_v54 }
 0x26c   : >> { %1450 = vst [vmem:[#allocation4] sm:$0xff] %v1446_v58 }
 0x26d   : >> { %1452 = vst [vmem:[#allocation4 + $0x8] sm:$0xff] %v1448_v61 }
 0x26f PF: > { %v2397_v62 = vld [vmem:[#allocation14 + $0x70] sm:$0xf]  ;;  %v2592_v63 = vld [vmem:[#allocation14 + $0x74] sm:$0xf0]  ;;  %v2591_v5 = vld [vmem:[#allocation14 + $0x74] sm:$0xf] }
 0x270   : > { %v2461_v0 = vld [vmem:[#allocation14 + $0xf0] sm:$0xf]  ;;  %v2398_v2 = vor.u32 %v2592_v63, %v2397_v62  ;;  %v2608_v4 = vld [vmem:[#allocation14 + $0xf4] sm:$0xf0]  ;;  %v2399_v6 = vld [vmem:[#allocation14 + $0x78] sm:$0xf0] }
 0x271   : > { %v2462_v9 = vor.u32 %v2608_v4, %v2461_v0  ;;  %v2402_v12 = vor.u32 %v2591_v5, %v2399_v6  ;;  %v2607_v15 = vld [vmem:[#allocation14 + $0xf4] sm:$0xf]  ;;  %v2463_v17 = vld [vmem:[#allocation14 + $0xf8] sm:$0xf0]  ;;  %v2389_v18 = vld [vmem:[#allocation14 + $0x60] sm:$0xf] }
 0x272   : > { %1658 = vmatpush.bf16.msra.mxu0 %v2398_v2  ;;  %v2466_v19 = vor.u32 %v2607_v15, %v2463_v17  ;;  %v2590_v20 = vld [vmem:[#allocation14 + $0x64] sm:$0xf0]  ;;  %v2453_v21 = vld [vmem:[#allocation14 + $0xe0] sm:$0xf]  ;;  %v2589_v59 = vld [vmem:[#allocation14 + $0x64] sm:$0xf] }
 0x273   : > { %v2606_v22 = vld [vmem:[#allocation14 + $0xe4] sm:$0xf0]  ;;  %1672 = vmatpush.bf16.msra.mxu1 %v2462_v9  ;;  %1686 = vmatpush.bf16.msra.mxu2 %v2402_v12  ;;  %v2390_v3 = vor.u32 %v2590_v20, %v2389_v18  ;;  %v2391_v60 = vld [vmem:[#allocation14 + $0x68] sm:$0xf0]  ;;  %v2605_v1 = vld [vmem:[#allocation14 + $0xe4] sm:$0xf] }
 0x274   : > { %v2454_v56 = vor.u32 %v2606_v22, %v2453_v21  ;;  %1700 = vmatpush.bf16.msra.mxu3 %v2466_v19  ;;  %v2394_v7 = vor.u32 %v2589_v59, %v2391_v60  ;;  %v2455_v8 = vld [vmem:[#allocation14 + $0xe8] sm:$0xf0]  ;;  %v2381_v10 = vld [vmem:[#allocation14 + $0x50] sm:$0xf]  ;;  %v2588_v11 = vld [vmem:[#allocation14 + $0x54] sm:$0xf0] }
 0x275   : > { %v2458_v13 = vor.u32 %v2605_v1, %v2455_v8  ;;  %v2445_v14 = vld [vmem:[#allocation14 + $0xd0] sm:$0xf]  ;;  %v2604_v23 = vld [vmem:[#allocation14 + $0xd4] sm:$0xf0]  ;;  %v2587_v24 = vld [vmem:[#allocation14 + $0x54] sm:$0xf]  ;;  %v2382_v25 = vor.u32 %v2588_v11, %v2381_v10 }
 0x276   : > { %1659 = vmatpush.bf16.msra.mxu0 %v2390_v3  ;;  %v2383_v26 = vld [vmem:[#allocation14 + $0x58] sm:$0xf0]  ;;  %v2603_v27 = vld [vmem:[#allocation14 + $0xd4] sm:$0xf]  ;;  %v2446_v29 = vor.u32 %v2604_v23, %v2445_v14  ;;  %v2373_v31 = vld [vmem:[#allocation14 + $0x40] sm:$0xf] }
 0x277   : > { %v2447_v28 = vld [vmem:[#allocation14 + $0xd8] sm:$0xf0]  ;;  %1673 = vmatpush.bf16.msra.mxu1 %v2454_v56  ;;  %1687 = vmatpush.bf16.msra.mxu2 %v2394_v7  ;;  %v2386_v30 = vor.u32 %v2587_v24, %v2383_v26  ;;  %v2586_v32 = vld [vmem:[#allocation14 + $0x44] sm:$0xf0]  ;;  %v2437_v33 = vld [vmem:[#allocation14 + $0xc0] sm:$0xf] }
 0x278   : > { %1701 = vmatpush.bf16.msra.mxu3 %v2458_v13  ;;  %v2450_v34 = vor.u32 %v2603_v27, %v2447_v28  ;;  %v2602_v35 = vld [vmem:[#allocation14 + $0xc4] sm:$0xf0]  ;;  %v2585_v36 = vld [vmem:[#allocation14 + $0x44] sm:$0xf]  ;;  %v2375_v37 = vld [vmem:[#allocation14 + $0x48] sm:$0xf0]  ;;  %v2374_v40 = vor.u32 %v2586_v32, %v2373_v31 }
 0x279   : > { %v2601_v38 = vld [vmem:[#allocation14 + $0xc4] sm:$0xf]  ;;  %v2439_v39 = vld [vmem:[#allocation14 + $0xc8] sm:$0xf0]  ;;  %v2438_v41 = vor.u32 %v2602_v35, %v2437_v33  ;;  %v2378_v42 = vor.u32 %v2585_v36, %v2375_v37  ;;  %v2365_v43 = vld [vmem:[#allocation14 + $0x30] sm:$0xf] }
 0x27a   : > { %1660 = vmatpush.bf16.msra.mxu0 %v2382_v25  ;;  %v2584_v44 = vld [vmem:[#allocation14 + $0x34] sm:$0xf0]  ;;  %v2429_v45 = vld [vmem:[#allocation14 + $0xb0] sm:$0xf]  ;;  %v2442_v46 = vor.u32 %v2601_v38, %v2439_v39  ;;  %v2583_v48 = vld [vmem:[#allocation14 + $0x34] sm:$0xf] }
 0x27b   : > { %1674 = vmatpush.bf16.msra.mxu1 %v2446_v29  ;;  %1688 = vmatpush.bf16.msra.mxu2 %v2386_v30  ;;  %v2600_v47 = vld [vmem:[#allocation14 + $0xb4] sm:$0xf0]  ;;  %v2367_v49 = vld [vmem:[#allocation14 + $0x38] sm:$0xf0]  ;;  %v2599_v50 = vld [vmem:[#allocation14 + $0xb4] sm:$0xf]  ;;  %v2366_v52 = vor.u32 %v2584_v44, %v2365_v43 }
 0x27c   : > { %1702 = vmatpush.bf16.msra.mxu3 %v2450_v34  ;;  %v2431_v51 = vld [vmem:[#allocation14 + $0xb8] sm:$0xf0]  ;;  %v2430_v53 = vor.u32 %v2600_v47, %v2429_v45  ;;  %v2370_v16 = vor.u32 %v2583_v48, %v2367_v49  ;;  %v2357_v54 = vld [vmem:[#allocation14 + $0x20] sm:$0xf]  ;;  %v2582_v55 = vld [vmem:[#allocation14 + $0x24] sm:$0xf0] }
 0x27d   : > { %v2421_v57 = vld [vmem:[#allocation14 + $0xa0] sm:$0xf]  ;;  %v2434_v58 = vor.u32 %v2599_v50, %v2431_v51  ;;  %v2598_v61 = vld [vmem:[#allocation14 + $0xa4] sm:$0xf0]  ;;  %v2581_v62 = vld [vmem:[#allocation14 + $0x24] sm:$0xf]  ;;  %v2358_v4 = vor.u32 %v2582_v55, %v2357_v54 }
 0x27e   : > { %1661 = vmatpush.bf16.msra.mxu0 %v2374_v40  ;;  %v2359_v63 = vld [vmem:[#allocation14 + $0x28] sm:$0xf0]  ;;  %v2597_v0 = vld [vmem:[#allocation14 + $0xa4] sm:$0xf]  ;;  %v2422_v5 = vor.u32 %v2598_v61, %v2421_v57  ;;  %v2349_v9 = vld [vmem:[#allocation14 + $0x10] sm:$0xf] }
 0x27f   : > { %1675 = vmatpush.bf16.msra.mxu1 %v2438_v41  ;;  %1689 = vmatpush.bf16.msra.mxu2 %v2378_v42  ;;  %v2423_v2 = vld [vmem:[#allocation14 + $0xa8] sm:$0xf0]  ;;  %v2362_v6 = vor.u32 %v2581_v62, %v2359_v63  ;;  %v2580_v12 = vld [vmem:[#allocation14 + $0x14] sm:$0xf0]  ;;  %v2413_v15 = vld [vmem:[#allocation14 + $0x90] sm:$0xf] }
 0x280   : > { %1703 = vmatpush.bf16.msra.mxu3 %v2442_v46  ;;  %v2426_v17 = vor.u32 %v2597_v0, %v2423_v2  ;;  %v2596_v18 = vld [vmem:[#allocation14 + $0x94] sm:$0xf0]  ;;  %v2579_v19 = vld [vmem:[#allocation14 + $0x14] sm:$0xf]  ;;  %v2351_v20 = vld [vmem:[#allocation14 + $0x18] sm:$0xf0]  ;;  %v2350_v3 = vor.u32 %v2580_v12, %v2349_v9 }
 0x281   : > { %v2595_v21 = vld [vmem:[#allocation14 + $0x94] sm:$0xf]  ;;  %v2415_v22 = vld [vmem:[#allocation14 + $0x98] sm:$0xf0]  ;;  %v2414_v56 = vor.u32 %v2596_v18, %v2413_v15  ;;  %v2354_v59 = vor.u32 %v2579_v19, %v2351_v20  ;;  %v2341_v60 = vld [vmem:[#allocation14] sm:$0xf] }
 0x282   : > { %1662 = vmatpush.bf16.msra.mxu0 %v2366_v52  ;;  %v2578_v1 = vld [vmem:[#allocation14 + $0x4] sm:$0xf0]  ;;  %v2405_v7 = vld [vmem:[#allocation14 + $0x80] sm:$0xf]  ;;  %v2418_v8 = vor.u32 %v2595_v21, %v2415_v22  ;;  %v2577_v11 = vld [vmem:[#allocation14 + $0x4] sm:$0xf] }
 0x283   : > { %1676 = vmatpush.bf16.msra.mxu1 %v2430_v53  ;;  %1690 = vmatpush.bf16.msra.mxu2 %v2370_v16  ;;  %v2594_v10 = vld [vmem:[#allocation14 + $0x84] sm:$0xf0]  ;;  %v2343_v13 = vld [vmem:[#allocation14 + $0x8] sm:$0xf0]  ;;  %v2593_v14 = vld [vmem:[#allocation14 + $0x84] sm:$0xf]  ;;  %v2342_v24 = vor.u32 %v2578_v1, %v2341_v60 }
 0x284   : > { %1704 = vmatpush.bf16.msra.mxu3 %v2434_v58  ;;  %v2407_v23 = vld [vmem:[#allocation14 + $0x88] sm:$0xf0]  ;;  %v1454_v26 = vld [vmem:[#allocation4] sm:$0xff]  ;;  %v2406_v27 = vor.u32 %v2594_v10, %v2405_v7  ;;  %v2346_v28 = vor.u32 %v2577_v11, %v2343_v13  ;;  %v1456_v29 = vld [vmem:[#allocation4 + $0x18] sm:$0xff]  ;;  %s2609_s18 = sshll.u32 %s3052_s12, 2  ;;  %s2470_s22 = sshll.u32 %s3056_s13, 4 }
 0x285   : > { %v1453_v25 = vld [vmem:[#allocation4 + $0x10] sm:$0xff]  ;;  %v1457_v30 = vld [vmem:[#allocation4 + $0x8] sm:$0xff]  ;;  %v2410_v31 = vor.u32 %v2593_v14, %v2407_v23  ;;  %v1492_v34 = vld [vmem:[%s3463_s8] sm:$0x3]  ;;  %s1731_s19 = sadd.s32 %s2609_s18, %s2470_s22  ;;  %s3500_s13 = sld [smem:[#allocation32_spill]] }
 0x286   : > { %1663 = vmatpush.bf16.msra.mxu0 %v2358_v4  ;;  %v1458_v32 = vpack.c.bf16 %v1454_v26, %v1453_v25  ;;  %v1459_v33 = vpack.c.bf16 %v1457_v30, %v1456_v29  ;;  %v1494_v35 = vperm.slane %v1492_v34, 0  ;;  %v1495_v40 = vperm.slane %v1492_v34, 1  ;;  %s2471_s21 = sshll.u32 %s1731_s19, 3  ;;  %s1734_s23 = sshll.u32 %s3373_s27, 4  ;;  %s1735_s23 = int_to_ptr.vmem [resolvable:$true] %s1734_s23 }
 0x287   : > { %1677 = vmatpush.bf16.msra.mxu1 %v2422_v5  ;;  %1691 = vmatpush.bf16.msra.mxu2 %v2362_v6  ;;  %s1719_s25 = scalar_lea.sflag [#allocation7], %s3288_s2 }
 0x288   : > { %1705 = vmatpush.bf16.msra.mxu3 %v2426_v17 }
 0x28a   : > { %1664 = vmatpush.bf16.msra.mxu0 %v2350_v3 }
 0x28b   : > { %1678 = vmatpush.bf16.msra.mxu1 %v2414_v56  ;;  %1692 = vmatpush.bf16.msra.mxu2 %v2354_v59  ;;  %s3501_s3 = smov %s3500_s13  ;;  %s1733_s17 = scalar_lea.hbm %s3500_s13, %s2471_s21 }
 0x28c   : > { %1706 = vmatpush.bf16.msra.mxu3 %v2418_v8  ;;  %s1736_s9 = sshll.u32 %s1733_s17, 4  ;;  %s2974_s29 = scalar_lea.hbm %s3501_s3, 256  ;;  %s1737_s9 = int_to_ptr.hbm [resolvable:$true] %s1736_s9 }
 0x28d   : > { %s2968_s20 = sshra.s32 %s1737_s9, 4  ;;  %s2969_s20 = int_to_ptr.hbm [resolvable:$true] %s2968_s20 }
 0x28e   : > { %1665 = vmatpush.bf16.msra.mxu0 %v2342_v24  ;;  %s2970_s26 = scalar_lea.hbm %s2969_s20, 32  ;;  %p2975_p11 = scmp.lt.s32.totalorder %s2969_s20, %s3501_s3 }
 0x28f   : > { %1679 = vmatpush.bf16.msra.mxu1 %v2406_v27  ;;  %1693 = vmatpush.bf16.msra.mxu2 %v2346_v28  ;;  %p2971_p7 = scmp.ne.s32.totalorder %s2969_s20, %s2970_s26  ;;  %p2976_p12 = scmp.lt.s32.totalorder %s2974_s29, %s2970_s26 }
 0x290   : > { %1707 = vmatpush.bf16.msra.mxu3 %v2410_v31 }
 0x291   : > { %1666 = vmatmul.bf16.vlgmr.msra.gmra.mxu0 %v1458_v32  ;;  %p2972_p8 = pnand %p2971_p7, %p3259_p0  ;;  %p2977_p13 = por %p2976_p12, %p2975_p11 }
 0x292   : > { %1680 = vmatmul.bf16.vlgmr.msra.gmra.mxu1 %v1459_v33  ;;  %1694 = vmatmul.bf16.vlgmr.msra.gmra.mxu2 %v1458_v32 }
 0x293   : > { %1708 = vmatmul.bf16.vlgmr.msra.gmra.mxu3 %v1459_v33  ;;  %p2973_p10 = pneg %p2972_p8 }
 0x295   : > { %p2978_p4 = pnand %p2977_p13, %p2973_p10 }
 0x30e   : > { %v1667_v36 = vpop.f32.mrf.mxu0 }
 0x30f   : > { %v1668_v37 = vadd.f32 %v1667_v36, %v1494_v35  ;;  %v1681_v38 = vpop.f32.mrf.mxu1 }
 0x311   : > { %v1682_v39 = vadd.f32 %v1681_v38, %v1668_v37 }
 0x313   : > { %1714 = vst [vmem:[%s3373_s27] sm:$0xff] %v1682_v39 }
 0x315   : > { %v1695_v41 = vpop.f32.mrf.mxu2 }
 0x316   : > { %v1696_v42 = vadd.f32 %v1695_v41, %v1495_v40  ;;  %v1709_v43 = vpop.f32.mrf.mxu3  ;;  %v1669_v44 = vpop.f32.mrf.mxu0 }
 0x317   : > { %v1670_v45 = vadd.f32 %v1669_v44, %v1494_v35  ;;  %v1683_v47 = vpop.f32.mrf.mxu1 }
 0x318   : > { %v1710_v46 = vadd.f32 %v1709_v43, %v1696_v42 }
 0x319   : > { %v1684_v48 = vadd.f32 %v1683_v47, %v1670_v45 }
 0x31a   : > { %1715 = vst [vmem:[%s3373_s27 + $0x8] sm:$0xff] %v1710_v46 }
 0x31b   : > { %1716 = vst [vmem:[%s3373_s27 + $0x10] sm:$0xff] %v1684_v48 }
 0x31d   : > { %v1697_v49 = vpop.f32.mrf.mxu2 }
 0x31e   : > { %v1698_v50 = vadd.f32 %v1697_v49, %v1495_v40  ;;  %v1711_v51 = vpop.f32.mrf.mxu3 }
 0x320   : > { %v1712_v52 = vadd.f32 %v1711_v51, %v1698_v50 }
 0x322   : > { %1717 = vst [vmem:[%s3373_s27 + $0x18] sm:$0xff] %v1712_v52 }
 0x323   : > { %2981 = shalt.err (!%p2978_p4)
}
 0x324   : > { %s3082_s2 = smov 256   ;;  %s3083_s27 = smov 16  }
 0x325   : > { %2654 = dma.vmem_to_hbm [thread:$0]  (%p3259_p0), %s1735_s23, 512, %s1737_s9, %s1719_s25, %s3082_s2, %s3082_s2, %s3083_s27  }
 0x326 PF: > { %s3502_s18 = sld [smem:[#allocation23_spill]] }
 0x327   : > { %s3503_s22 = sld [smem:[#allocation22_spill]] }
 0x32c   : > { %p2691_p5 = scmp.ge.s32.totalorder %s3502_s18, 2 }
 0x32d   : > { %s1751_s21 = sand.u32 1, %s3503_s22  }
 0x32e   : > { %p2677_p6 = pnand %p2691_p5, %p3265_p2  ;;  %s1752_s12 = scalar_lea.sflag [#allocation7], %s1751_s21 }
 0x330   : > { %p2678_p9 = pneg %p2677_p6 }
 0x332   : > { %3035 = dma.done.wait (%p2678_p9), %s1752_s12, 512  }
 0x333   : > { %3037 = vsyncadd (%p2678_p9), %s1752_s12, 4294966784  ;;  %s28_s16 = sadd.s32 1, %s3502_s18   ;;  %s3505_s28 = sld [smem:[#allocation24_spill]] }
 0x334   : > { %p25_p1 = scmp.ge.s32.totalorder %s28_s16, 10   ;;  %s3506_s24 = sld [smem:[#allocation25_spill]] }
 0x335   : > { %s3507_s30 = smov %s3044_s10  ;;  %s3508_s10 = smov %s3048_s11 }
 0x336   : > { %s3509_s11 = smov %s3275_s1  ;;  %s3510_s12 = smov %s3060_s14 }
 0x337   : > { %s3511_s13 = smov %s3064_s15  ;;  %27 = sbr.rel (!%p25_p1) target bundleno = 17 (0x11), region = 146 }
 0x339   : > { %s3512_s14 = smov %s3505_s28 }
 0x33a   : > { %s3513_s15 = smov %s3506_s24 }
 0x33c   :  { %1758 = vsyncpa [#allocation6], 1 }
 0x33d   :  { %1760 = vsyncpa [#allocation6 + $0x1], 1 }
 0x33e   :  { %1761 = vsyncpa [#allocation9], 1 }
 0x33f   :  { %1762 = vsyncpa [#allocation12], 1 }
 0x340   :  { %1763 = vsyncpa [#allocation15], 1 }
 0x341   :  { %1764 = vsyncpa [#allocation7], 1 }
 0x342   :  { %1766 = vsyncpa [#allocation7 + $0x1], 1 }

</bundles_post_ra>
